<compile_context>
chip_gen: v7x
topology: tpu7x:2x2x1
jax: 0.10.0
libtpu: 0.0.40
codegen_flags: <defaults>
</compile_context>

<pallas_src>
import jax
import jax.numpy as jnp
from jax.experimental import pallas as pl
from jax.experimental.pallas import tpu as pltpu

D_IN = 600    # logical feature dim
D_PAD = 640   # 600 rounded up to a multiple of 128 (lane width)
N_PAD = 128   # fc3's 1-wide output padded to one full lane register


def mlp_kernel(x_ref, w1_ref, b1_ref, w2_ref, b2_ref, w3_ref, b3_ref, o_ref):
    # fc1 + relu   (bf16 MXU inputs, f32 accumulate, f32 elementwise)
    h1 = jnp.dot(x_ref[...], w1_ref[...], preferred_element_type=jnp.float32)
    h1 = jnp.maximum(h1 + b1_ref[...], 0.0)
    # fc2 + tanh
    h2 = jnp.dot(h1.astype(jnp.bfloat16), w2_ref[...],
                 preferred_element_type=jnp.float32)
    h2 = jnp.tanh(h2 + b2_ref[...])
    # fc3 (padded to 128 output lanes -> unmasked, lane-dense vst)
    out = jnp.dot(h2.astype(jnp.bfloat16), w3_ref[...],
                  preferred_element_type=jnp.float32)
    o_ref[...] = out + b3_ref[...]


def _round_up(n, m):
    return (n + m - 1) // m * m


def mlp_forward(x, w1, b1, w2, b2, w3, b3, *, block_b=256):
    """x: (B, 600) f32. w*: (in, out) f32. b*: (out,) f32. Returns (B, 1) f32."""
    B = x.shape[0]

    # Batch tile: up to `block_b` rows per grid step (multiple of 8 sublanes).
    # Weights are resident in VMEM across all grid steps; only x/out pipeline.
    tb = min(block_b, _round_up(max(B, 8), 8))
    Bp = _round_up(B, tb)

    # ---- pad + cast once in the wrapper (zero padding) ----
    xp = jnp.zeros((Bp, D_PAD), jnp.bfloat16).at[:B, :D_IN].set(
        x.astype(jnp.bfloat16))

    def pad_w(w, n_out):
        return jnp.zeros((D_PAD, n_out), jnp.bfloat16).at[
            :w.shape[0], :w.shape[1]].set(w.astype(jnp.bfloat16))

    def pad_b(b, n_out):
        b2d = jnp.asarray(b, jnp.float32).reshape(1, -1)
        return jnp.zeros((1, n_out), jnp.float32).at[:, :b2d.shape[1]].set(b2d)

    w1p, b1p = pad_w(w1, D_PAD), pad_b(b1, D_PAD)
    w2p, b2p = pad_w(w2, D_PAD), pad_b(b2, D_PAD)
    w3p, b3p = pad_w(w3, N_PAD), pad_b(b3, N_PAD)

    resident = lambda shape: pl.BlockSpec(shape, lambda i: (0, 0))

    out_padded = pl.pallas_call(
        mlp_kernel,
        out_shape=jax.ShapeDtypeStruct((Bp, N_PAD), jnp.float32),
        grid_spec=pltpu.PrefetchScalarGridSpec(
            num_scalar_prefetch=0,
            grid=(Bp // tb,),
            in_specs=[
                pl.BlockSpec((tb, D_PAD), lambda i: (i, 0)),   # x tile
                resident((D_PAD, D_PAD)),                      # w1 (bf16)
                resident((1, D_PAD)),                          # b1 (f32)
                resident((D_PAD, D_PAD)),                      # w2 (bf16)
                resident((1, D_PAD)),                          # b2 (f32)
                resident((D_PAD, N_PAD)),                      # w3 (bf16)
                resident((1, N_PAD)),                          # b3 (f32)
            ],
            out_specs=pl.BlockSpec((tb, N_PAD), lambda i: (i, 0)),
        ),
        compiler_params=pltpu.CompilerParams(
            dimension_semantics=("parallel",),  # shard batch across TCs (v7x)
        ),
    )(xp, w1p, b1p, w2p, b2p, w3p, b3p)

    return out_padded[:B, :1]


def init_params(key, in_dim, out_dim):
    # Deterministic PyTorch-style (uniform +/- 1/sqrt(in)) init.
    kw, kb = jax.random.split(key)
    bound = 1.0 / (in_dim ** 0.5)
    w = jax.random.uniform(kw, (in_dim, out_dim), jnp.float32, -bound, bound)
    b = jax.random.uniform(kb, (out_dim,), jnp.float32, -bound, bound)
    return w, b


if __name__ == "__main__":
    key = jax.random.PRNGKey(0)
    k_x, k1, k2, k3 = jax.random.split(key, 4)

    B, D = 8, 600
    x = jax.random.normal(k_x, (B, D), jnp.float32)

    w1, b1 = init_params(k1, D, D)      # fc1: Linear(600, 600)
    w2, b2 = init_params(k2, D, D)      # fc2: Linear(600, 600)
    w3, b3 = init_params(k3, D, 1)      # fc3: Linear(600, 1)

    out = jax.block_until_ready(mlp_forward(x, w1, b1, w2, b2, w3, b3))
    assert out.shape == (B, 1)

    # Reference with the same numerics as the kernel (bf16 matmul inputs,
    # f32 accumulation / activations).
    xb = x.astype(jnp.bfloat16)
    h = jnp.dot(xb, w1.astype(jnp.bfloat16), preferred_element_type=jnp.float32)
    h = jnp.maximum(h + b1, 0.0)
    h = jnp.dot(h.astype(jnp.bfloat16), w2.astype(jnp.bfloat16),
                preferred_element_type=jnp.float32)
    h = jnp.tanh(h + b2)
    ref_bf16 = jnp.dot(h.astype(jnp.bfloat16), w3.astype(jnp.bfloat16),
                       preferred_element_type=jnp.float32) + b3
    assert jnp.allclose(out, ref_bf16, atol=5e-3, rtol=5e-3)

    # Full-f32 semantic reference (loose tolerance: bf16 matmul inputs).
    h32 = jnp.maximum(x @ w1 + b1, 0.0)
    h32 = jnp.tanh(h32 @ w2 + b2)
    ref_f32 = h32 @ w3 + b3
    assert jnp.allclose(out, ref_f32, atol=5e-2, rtol=5e-2)

    print("KERNEL_OK")
</pallas_src>

<mosaic_0001>
module attributes {stable_mosaic.version = 11 : i64} {
  func.func @mlp_kernel(%arg0: i32, %arg1: memref<8x640xbf16, #tpu.memory_space<vmem>>, %arg2: memref<640x640xbf16, #tpu.memory_space<vmem>>, %arg3: memref<1x640xf32, #tpu.memory_space<vmem>>, %arg4: memref<640x640xbf16, #tpu.memory_space<vmem>>, %arg5: memref<1x640xf32, #tpu.memory_space<vmem>>, %arg6: memref<640x128xbf16, #tpu.memory_space<vmem>>, %arg7: memref<1x128xf32, #tpu.memory_space<vmem>>, %arg8: memref<8x128xf32, #tpu.memory_space<vmem>>) attributes {dimension_semantics = [#tpu.dimension_semantics<parallel>], iteration_bounds = array<i64: 1>, scalar_prefetch = 0 : i64, scratch_operands = 0 : i64, tpu.core_type = #tpu.core_type<tc>, window_params = [{transform_indices = @transform_0, window_bounds = array<i64: 8, 640>}, {pipeline_mode = #tpu.pipeline_mode<synchronous>, transform_indices = @transform_1, window_bounds = array<i64: 640, 640>}, {pipeline_mode = #tpu.pipeline_mode<synchronous>, transform_indices = @transform_2, window_bounds = array<i64: 1, 640>}, {pipeline_mode = #tpu.pipeline_mode<synchronous>, transform_indices = @transform_3, window_bounds = array<i64: 640, 640>}, {pipeline_mode = #tpu.pipeline_mode<synchronous>, transform_indices = @transform_4, window_bounds = array<i64: 1, 640>}, {pipeline_mode = #tpu.pipeline_mode<synchronous>, transform_indices = @transform_5, window_bounds = array<i64: 640, 128>}, {pipeline_mode = #tpu.pipeline_mode<synchronous>, transform_indices = @transform_6, window_bounds = array<i64: 1, 128>}, {transform_indices = @transform_7, window_bounds = array<i64: 8, 128>}]} {
    %c0 = arith.constant 0 : index
    %c0_0 = arith.constant 0 : index
    %0 = vector.load %arg1[%c0, %c0_0] : memref<8x640xbf16, #tpu.memory_space<vmem>>, vector<8x640xbf16>
    %c0_1 = arith.constant 0 : index
    %c0_2 = arith.constant 0 : index
    %1 = vector.load %arg2[%c0_1, %c0_2] : memref<640x640xbf16, #tpu.memory_space<vmem>>, vector<640x640xbf16>
    %cst = arith.constant dense<0.000000e+00> : vector<8x640xf32>
    %2 = tpu.matmul %0, %1, %cst {dimension_numbers = #tpu.dot_dimension_numbers<[1], [0], [0], [1], [0, 0, 1, 1], [], []>} : vector<8x640xbf16>, vector<640x640xbf16>, vector<8x640xf32> -> vector<8x640xf32>
    %c0_3 = arith.constant 0 : index
    %c0_4 = arith.constant 0 : index
    %3 = vector.load %arg3[%c0_3, %c0_4] : memref<1x640xf32, #tpu.memory_space<vmem>>, vector<1x640xf32>
    %4 = vector.broadcast %3 : vector<1x640xf32> to vector<8x640xf32>
    %5 = arith.addf %2, %4 : vector<8x640xf32>
    %cst_5 = arith.constant 0.000000e+00 : f32
    %6 = vector.broadcast %cst_5 : f32 to vector<8x640xf32>
    %7 = arith.maximumf %5, %6 : vector<8x640xf32>
    %8 = arith.truncf %7 : vector<8x640xf32> to vector<8x640xbf16>
    %c0_6 = arith.constant 0 : index
    %c0_7 = arith.constant 0 : index
    %9 = vector.load %arg4[%c0_6, %c0_7] : memref<640x640xbf16, #tpu.memory_space<vmem>>, vector<640x640xbf16>
    %cst_8 = arith.constant dense<0.000000e+00> : vector<8x640xf32>
    %10 = tpu.matmul %8, %9, %cst_8 {dimension_numbers = #tpu.dot_dimension_numbers<[1], [0], [0], [1], [0, 0, 1, 1], [], []>} : vector<8x640xbf16>, vector<640x640xbf16>, vector<8x640xf32> -> vector<8x640xf32>
    %c0_9 = arith.constant 0 : index
    %c0_10 = arith.constant 0 : index
    %11 = vector.load %arg5[%c0_9, %c0_10] : memref<1x640xf32, #tpu.memory_space<vmem>>, vector<1x640xf32>
    %12 = vector.broadcast %11 : vector<1x640xf32> to vector<8x640xf32>
    %13 = arith.addf %10, %12 : vector<8x640xf32>
    %14 = math.tanh %13 : vector<8x640xf32>
    %15 = arith.truncf %14 : vector<8x640xf32> to vector<8x640xbf16>
    %c0_11 = arith.constant 0 : index
    %c0_12 = arith.constant 0 : index
    %16 = vector.load %arg6[%c0_11, %c0_12] : memref<640x128xbf16, #tpu.memory_space<vmem>>, vector<640x128xbf16>
    %cst_13 = arith.constant dense<0.000000e+00> : vector<8x128xf32>
    %17 = tpu.matmul %15, %16, %cst_13 {dimension_numbers = #tpu.dot_dimension_numbers<[1], [0], [0], [1], [0, 0, 1, 1], [], []>} : vector<8x640xbf16>, vector<640x128xbf16>, vector<8x128xf32> -> vector<8x128xf32>
    %c0_14 = arith.constant 0 : index
    %c0_15 = arith.constant 0 : index
    %18 = vector.load %arg7[%c0_14, %c0_15] : memref<1x128xf32, #tpu.memory_space<vmem>>, vector<1x128xf32>
    %19 = vector.broadcast %18 : vector<1x128xf32> to vector<8x128xf32>
    %20 = arith.addf %17, %19 : vector<8x128xf32>
    %c0_16 = arith.constant 0 : index
    %c0_17 = arith.constant 0 : index
    %21 = vector.load %arg8[%c0_16, %c0_17] : memref<8x128xf32, #tpu.memory_space<vmem>>, vector<8x128xf32>
    tpu.vector_store %arg8[%c0_16, %c0_17], %20 {strides = array<i32>} : memref<8x128xf32, #tpu.memory_space<vmem>>, vector<8x128xf32>,
    return
  }
  func.func @transform_0(%arg0: i32) -> (i32, i32) {
    %c0_i32 = arith.constant 0 : i32
    %c0_i32_0 = arith.constant 0 : i32
    return %arg0, %c0_i32 : i32, i32
  }
  func.func @transform_1(%arg0: i32) -> (i32, i32) {
    %c0_i32 = arith.constant 0 : i32
    %c0_i32_0 = arith.constant 0 : i32
    %c0_i32_1 = arith.constant 0 : i32
    return %c0_i32, %c0_i32_0 : i32, i32
  }
  func.func @transform_2(%arg0: i32) -> (i32, i32) {
    %c0_i32 = arith.constant 0 : i32
    %c0_i32_0 = arith.constant 0 : i32
    %c0_i32_1 = arith.constant 0 : i32
    return %c0_i32, %c0_i32_0 : i32, i32
  }
  func.func @transform_3(%arg0: i32) -> (i32, i32) {
    %c0_i32 = arith.constant 0 : i32
    %c0_i32_0 = arith.constant 0 : i32
    %c0_i32_1 = arith.constant 0 : i32
    return %c0_i32, %c0_i32_0 : i32, i32
  }
  func.func @transform_4(%arg0: i32) -> (i32, i32) {
    %c0_i32 = arith.constant 0 : i32
    %c0_i32_0 = arith.constant 0 : i32
    %c0_i32_1 = arith.constant 0 : i32
    return %c0_i32, %c0_i32_0 : i32, i32
  }
  func.func @transform_5(%arg0: i32) -> (i32, i32) {
    %c0_i32 = arith.constant 0 : i32
    %c0_i32_0 = arith.constant 0 : i32
    %c0_i32_1 = arith.constant 0 : i32
    return %c0_i32, %c0_i32_0 : i32, i32
  }
  func.func @transform_6(%arg0: i32) -> (i32, i32) {
    %c0_i32 = arith.constant 0 : i32
    %c0_i32_0 = arith.constant 0 : i32
    %c0_i32_1 = arith.constant 0 : i32
    return %c0_i32, %c0_i32_0 : i32, i32
  }
  func.func @transform_7(%arg0: i32) -> (i32, i32) {
    %c0_i32 = arith.constant 0 : i32
    %c0_i32_0 = arith.constant 0 : i32
    return %arg0, %c0_i32 : i32, i32
  }
}

</mosaic_0001>

<bundles_post_ra>
// kernel: tpu_custom_call.1
= control target key start
LH: loop header
LB: loop body
LE: loop exit
PB: predicated region body
PF: predicated region fallthrough
CT: control target
= control target key end

     0   :  { %12 = vsyncpa [#allocation3], 0  ;;  %s5640_s0 = inlined_call_operand.hbm [shape: bf16[8,640], index: 0, kind: input, shape index: {}]   ;;  %s5641_s1 = inlined_call_operand.hbm [shape: bf16[640,640], index: 1, kind: input, shape index: {}]   ;;  %s5642_s2 = inlined_call_operand.vmem [shape: f32[1,640], index: 2, kind: input, shape index: {}]   ;;  %s5643_s3 = inlined_call_operand.hbm [shape: bf16[640,640], index: 3, kind: input, shape index: {}]   ;;  %s5644_s4 = inlined_call_operand.vmem [shape: f32[1,640], index: 4, kind: input, shape index: {}]   ;;  %s5645_s5 = inlined_call_operand.hbm [shape: bf16[640,128], index: 5, kind: input, shape index: {}]   ;;  %s5646_s6 = inlined_call_operand.vmem [shape: f32[1,128], index: 6, kind: input, shape index: {}]   ;;  %s5647_s7 = inlined_call_operand.hbm [shape: f32[8,128], index: 7, kind: output, shape index: {}]  }
   0x1   :  { %13 = vsyncpa [#allocation6], 0 }
   0x2   :  { %14 = vsyncpa [#allocation9], 0 }
   0x3   :  { %15 = vsyncpa [#allocation4], 0  ;;  %s5383_s24 = smov [#allocation5]   ;;  %s5265_s28 = scalar_lea.hbm %s5641_s1, 25600 }
   0x4   :  { %s31_s25 = sshll.u32 %s5383_s24, 4  ;;  %p5266_p0 = scmp.ne.s32.totalorder %s5641_s1, %s5265_s28  ;;  %s32_s25 = int_to_ptr.vmem [resolvable:$true] %s31_s25 }
   0x5   :  { %p5269_p1 = scmp.lt.u32.totalorder %s5265_s28, %s5641_s1 }
   0x7   :  { %p5271_p2 = pnand %p5269_p1, %p5266_p0 }
   0x9   :  { %5274 = shalt.err (!%p5271_p2)
}
   0xa   :  { %s5275_s10 = scalar_lea.vmem %s32_s25, 25600  ;;  %p5280_p4 = scmp.lt.s32.totalorder %s32_s25, %s32_s25 }
   0xb   :  { %p5276_p3 = scmp.ne.s32.totalorder %s32_s25, %s5275_s10  ;;  %p5281_p5 = scmp.lt.s32.totalorder %s5275_s10, %s5275_s10 }
   0xd   :  { %p5282_p6 = por %p5281_p5, %p5280_p4 }
   0xf   :  { %p5283_p7 = pnand %p5282_p6, %p5276_p3 }
  0x11   :  { %5286 = shalt.err (!%p5283_p7)
}
  0x12   :  { %s5384_s11 = smov 320   ;;  %s5385_s12 = smov 20  }
  0x13   :  { %37 = dma.hbm_to_vmem [thread:$0]  %s5641_s1, 25600, %s32_s25, [#allocation6], %s5384_s11, %s5384_s11, %s5385_s12  }
  0x14   :  { %s5386_s15 = smov [#allocation2]   ;;  %s5387_s17 = smov [#allocation7]  }
  0x15   :  { %s22_s16 = sshll.u32 %s5386_s15, 4  ;;  %s45_s18 = sshll.u32 %s5387_s17, 4  ;;  %s23_s16 = int_to_ptr.vmem [resolvable:$true] %s22_s16  ;;  %s46_s18 = int_to_ptr.vmem [resolvable:$true] %s45_s18 }
  0x16   :  { %s5287_s21 = scalar_lea.hbm %s5640_s0, 320 }
  0x17   :  { %p5288_p8 = scmp.ne.s32.totalorder %s5640_s0, %s5287_s21  ;;  %p5291_p9 = scmp.lt.u32.totalorder %s5287_s21, %s5640_s0 }
  0x19   :  { %p5293_p10 = pnand %p5291_p9, %p5288_p8 }
  0x1b   :  { %5296 = shalt.err (!%p5293_p10)
}
  0x1c   :  { %s5297_s1 = scalar_lea.vmem %s23_s16, 320  ;;  %p5302_p12 = scmp.lt.s32.totalorder %s23_s16, %s23_s16 }
  0x1d   :  { %p5298_p11 = scmp.ne.s32.totalorder %s23_s16, %s5297_s1  ;;  %p5303_p13 = scmp.lt.s32.totalorder %s5297_s1, %s5297_s1 }
  0x1f   :  { %p5304_p0 = por %p5303_p13, %p5302_p12 }
  0x21   :  { %p5305_p1 = pnand %p5304_p0, %p5298_p11 }
  0x23   :  { %5308 = shalt.err (!%p5305_p1)
}
  0x24   :  { %25 = dma.hbm_to_vmem [thread:$0]  %s5640_s0, 320, %s23_s16, [#allocation3]  }
  0x25   :  { %s5309_s30 = scalar_lea.hbm %s5643_s3, 25600 }
  0x26   :  { %p5310_p2 = scmp.ne.s32.totalorder %s5643_s3, %s5309_s30  ;;  %p5313_p3 = scmp.lt.u32.totalorder %s5309_s30, %s5643_s3 }
  0x28   :  { %p5315_p4 = pnand %p5313_p3, %p5310_p2 }
  0x2a   :  { %5318 = shalt.err (!%p5315_p4)
}
  0x2b   :  { %s5319_s14 = scalar_lea.vmem %s46_s18, 25600  ;;  %p5324_p6 = scmp.lt.s32.totalorder %s46_s18, %s46_s18 }
  0x2c   :  { %p5320_p5 = scmp.ne.s32.totalorder %s46_s18, %s5319_s14  ;;  %p5325_p7 = scmp.lt.s32.totalorder %s5319_s14, %s5319_s14 }
  0x2e   :  { %p5326_p8 = por %p5325_p7, %p5324_p6 }
  0x30   :  { %p5327_p9 = pnand %p5326_p8, %p5320_p5 }
  0x32   :  { %5330 = shalt.err (!%p5327_p9)
}
  0x33   :  { %51 = dma.hbm_to_vmem [thread:$0]  %s5643_s3, 25600, %s46_s18, [#allocation6], %s5384_s11, %s5384_s11, %s5385_s12  }
  0x34   :  { %s5388_s16 = smov [#allocation8]   ;;  %s5331_s21 = scalar_lea.hbm %s5645_s5, 5120 }
  0x35   :  { %s59_s17 = sshll.u32 %s5388_s16, 4  ;;  %p5332_p10 = scmp.ne.s32.totalorder %s5645_s5, %s5331_s21  ;;  %s60_s17 = int_to_ptr.vmem [resolvable:$true] %s59_s17 }
  0x36   :  { %p5335_p11 = scmp.lt.u32.totalorder %s5331_s21, %s5645_s5 }
  0x38   :  { %p5337_p12 = pnand %p5335_p11, %p5332_p10 }
  0x3a   :  { %5340 = shalt.err (!%p5337_p12)
}
  0x3b   :  { %s5341_s1 = scalar_lea.vmem %s60_s17, 5120  ;;  %p5346_p0 = scmp.lt.s32.totalorder %s60_s17, %s60_s17 }
  0x3c   :  { %p5342_p13 = scmp.ne.s32.totalorder %s60_s17, %s5341_s1  ;;  %p5347_p1 = scmp.lt.s32.totalorder %s5341_s1, %s5341_s1 }
  0x3e   :  { %p5348_p2 = por %p5347_p1, %p5346_p0 }
  0x40   :  { %p5349_p3 = pnand %p5348_p2, %p5342_p13 }
  0x42   :  { %5352 = shalt.err (!%p5349_p3)
}
  0x43   :  { %s5389_s3 = smov 64   ;;  %s5390_s11 = smov 4  }
  0x44   :  { %65 = dma.hbm_to_vmem [thread:$0]  %s5645_s5, 5120, %s60_s17, [#allocation9], %s5389_s3, %s5389_s3, %s5390_s11  }
  0x45   :  { %5375 = dma.done.wait [#allocation3], 320  }
  0x46   :  { %5376 = vsyncadd [#allocation3], 4294966976 }
  0x47   :  { %5377 = dma.done.wait [#allocation6], 51200  }
  0x48   :  { %5378 = vsyncadd [#allocation6], 4294916096 }
  0x49   :  { %5379 = dma.done.wait [#allocation9], 5120  }
  0x4a   :  { %5380 = vsyncadd [#allocation9], 4294962176  ;;  %v4650_v0 = vld [vmem:[#allocation5 + $0x4] ss:$20 sps:$4 sm:$0xff]   ;;  %v4652_v1 = vld [vmem:[#allocation5 + $0xc] ss:$20 sps:$4 sm:$0xff]  }
  0x4b   :  { %1409 = vmatprep.subr.bf16.mxu0 %v4650_v0  ;;  %v4654_v2 = vld [vmem:[#allocation5] ss:$20 sps:$4 sm:$0xff]   ;;  %v4655_v3 = vld [vmem:[#allocation5 + $0x8] ss:$20 sps:$4 sm:$0xff]   ;;  %1532 = vmatprep.subr.bf16.mxu1 %v4652_v1  ;;  %v4661_v7 = vld [vmem:[#allocation5 + $0x30] ss:$20 sps:$4 sm:$0xff]  }
  0x4c   :  { %v4656_v4 = vld [vmem:[#allocation5 + $0x2c] ss:$20 sps:$4 sm:$0xff]   ;;  %1410 = vmatpush1.bf16.msra.mxu0 %v4654_v2  ;;  %1533 = vmatpush1.bf16.msra.mxu1 %v4655_v3  ;;  %v4658_v5 = vld [vmem:[#allocation5 + $0x34] ss:$20 sps:$4 sm:$0xff]   ;;  %v4664_v9 = vld [vmem:[#allocation5 + $0x5c] ss:$20 sps:$4 sm:$0xff]  }
  0x4d   :  { %v4660_v6 = vld [vmem:[#allocation5 + $0x28] ss:$20 sps:$4 sm:$0xff]   ;;  %1411 = vmatprep.subr.bf16.mxu0 %v4656_v4  ;;  %1534 = vmatprep.subr.bf16.mxu1 %v4658_v5  ;;  %v4666_v10 = vld [vmem:[#allocation5 + $0x50] ss:$20 sps:$4 sm:$0xff]   ;;  %v4667_v11 = vld [vmem:[#allocation5 + $0x58] ss:$20 sps:$4 sm:$0xff]  }
  0x4e   :  { %v4662_v8 = vld [vmem:[#allocation5 + $0x54] ss:$20 sps:$4 sm:$0xff]   ;;  %v4668_v12 = vld [vmem:[#allocation5 + $0x7c] ss:$20 sps:$4 sm:$0xff]   ;;  %v4670_v13 = vld [vmem:[#allocation5 + $0x84] ss:$20 sps:$4 sm:$0xff]  }
  0x4f   :  { %v4672_v14 = vld [vmem:[#allocation5 + $0x78] ss:$20 sps:$4 sm:$0xff]   ;;  %v4673_v15 = vld [vmem:[#allocation5 + $0x80] ss:$20 sps:$4 sm:$0xff]   ;;  %v4679_v19 = vld [vmem:[#allocation5 + $0xa8] ss:$20 sps:$4 sm:$0xff]  }
  0x50   :  { %1412 = vmatpush1.bf16.msra.mxu0 %v4660_v6  ;;  %1535 = vmatpush1.bf16.msra.mxu1 %v4661_v7  ;;  %v4674_v16 = vld [vmem:[#allocation5 + $0xa4] ss:$20 sps:$4 sm:$0xff]   ;;  %v4676_v17 = vld [vmem:[#allocation5 + $0xac] ss:$20 sps:$4 sm:$0xff]   ;;  %v4682_v21 = vld [vmem:[#allocation5 + $0xd4] ss:$20 sps:$4 sm:$0xff]  }
  0x51   :  { %1413 = vmatprep.subr.bf16.mxu0 %v4662_v8  ;;  %1536 = vmatprep.subr.bf16.mxu1 %v4664_v9  ;;  %v4678_v18 = vld [vmem:[#allocation5 + $0xa0] ss:$20 sps:$4 sm:$0xff]   ;;  %v4684_v22 = vld [vmem:[#allocation5 + $0xc8] ss:$20 sps:$4 sm:$0xff]   ;;  %v4685_v23 = vld [vmem:[#allocation5 + $0xd0] ss:$20 sps:$4 sm:$0xff]  }
  0x52   :  { %v4680_v20 = vld [vmem:[#allocation5 + $0xcc] ss:$20 sps:$4 sm:$0xff]   ;;  %v4686_v24 = vld [vmem:[#allocation5 + $0xf4] ss:$20 sps:$4 sm:$0xff]   ;;  %v4688_v25 = vld [vmem:[#allocation5 + $0xfc] ss:$20 sps:$4 sm:$0xff]  }
  0x53   :  { %v4690_v26 = vld [vmem:[#allocation5 + $0xf0] ss:$20 sps:$4 sm:$0xff]   ;;  %v4691_v27 = vld [vmem:[#allocation5 + $0xf8] ss:$20 sps:$4 sm:$0xff]   ;;  %v4697_v31 = vld [vmem:[#allocation5 + $0x120] ss:$20 sps:$4 sm:$0xff]  }
  0x54   :  { %1414 = vmatpush1.bf16.msra.mxu0 %v4666_v10  ;;  %1537 = vmatpush1.bf16.msra.mxu1 %v4667_v11  ;;  %v4692_v28 = vld [vmem:[#allocation5 + $0x11c] ss:$20 sps:$4 sm:$0xff]   ;;  %v4694_v29 = vld [vmem:[#allocation5 + $0x124] ss:$20 sps:$4 sm:$0xff]   ;;  %v4700_v33 = vld [vmem:[#allocation5 + $0x14c] ss:$20 sps:$4 sm:$0xff]  }
  0x55   :  { %1415 = vmatprep.subr.bf16.mxu0 %v4668_v12  ;;  %1538 = vmatprep.subr.bf16.mxu1 %v4670_v13  ;;  %v4696_v30 = vld [vmem:[#allocation5 + $0x118] ss:$20 sps:$4 sm:$0xff]   ;;  %v4702_v34 = vld [vmem:[#allocation5 + $0x140] ss:$20 sps:$4 sm:$0xff]   ;;  %v4703_v35 = vld [vmem:[#allocation5 + $0x148] ss:$20 sps:$4 sm:$0xff]  }
  0x56   :  { %v4698_v32 = vld [vmem:[#allocation5 + $0x144] ss:$20 sps:$4 sm:$0xff]   ;;  %v4704_v36 = vld [vmem:[#allocation5 + $0x16c] ss:$20 sps:$4 sm:$0xff]   ;;  %v4706_v37 = vld [vmem:[#allocation5 + $0x174] ss:$20 sps:$4 sm:$0xff]  }
  0x57   :  { %v4708_v38 = vld [vmem:[#allocation5 + $0x168] ss:$20 sps:$4 sm:$0xff]   ;;  %v4709_v39 = vld [vmem:[#allocation5 + $0x170] ss:$20 sps:$4 sm:$0xff]   ;;  %v4715_v43 = vld [vmem:[#allocation5 + $0x198] ss:$20 sps:$4 sm:$0xff]  }
  0x58   :  { %1416 = vmatpush1.bf16.msra.mxu0 %v4672_v14  ;;  %1539 = vmatpush1.bf16.msra.mxu1 %v4673_v15  ;;  %v4710_v40 = vld [vmem:[#allocation5 + $0x194] ss:$20 sps:$4 sm:$0xff]   ;;  %v4712_v41 = vld [vmem:[#allocation5 + $0x19c] ss:$20 sps:$4 sm:$0xff]   ;;  %v4718_v45 = vld [vmem:[#allocation5 + $0x1c4] ss:$20 sps:$4 sm:$0xff]  }
  0x59   :  { %1417 = vmatprep.subr.bf16.mxu0 %v4674_v16  ;;  %1540 = vmatprep.subr.bf16.mxu1 %v4676_v17  ;;  %v4714_v42 = vld [vmem:[#allocation5 + $0x190] ss:$20 sps:$4 sm:$0xff]   ;;  %v4720_v47 = vld [vmem:[#allocation5 + $0x1b8] ss:$20 sps:$4 sm:$0xff]   ;;  %v4721_v49 = vld [vmem:[#allocation5 + $0x1c0] ss:$20 sps:$4 sm:$0xff]  }
  0x5a   :  { %v4716_v44 = vld [vmem:[#allocation5 + $0x1bc] ss:$20 sps:$4 sm:$0xff]   ;;  %v4722_v50 = vld [vmem:[#allocation5 + $0x1e4] ss:$20 sps:$4 sm:$0xff]   ;;  %v4724_v51 = vld [vmem:[#allocation5 + $0x1ec] ss:$20 sps:$4 sm:$0xff]  }
  0x5b   :  { %v81_v46 = vld [vmem:[#allocation2] sm:$0xff]  ;;  %v4726_v52 = vld [vmem:[#allocation5 + $0x1e0] ss:$20 sps:$4 sm:$0xff]   ;;  %v4727_v53 = vld [vmem:[#allocation5 + $0x1e8] ss:$20 sps:$4 sm:$0xff]   ;;  %vm5393_vm0 = vmmov 0  }
  0x5c   :  { %1418 = vmatpush1.bf16.msra.mxu0 %v4678_v18  ;;  %1541 = vmatpush1.bf16.msra.mxu1 %v4679_v19  ;;  %v5489_v48 = vcombine.high %v81_v46, %v81_v46  ;;  %v4728_v54 = vld [vmem:[#allocation5 + $0x20c] ss:$20 sps:$4 sm:$0xff]   ;;  %v4730_v55 = vld [vmem:[#allocation5 + $0x214] ss:$20 sps:$4 sm:$0xff]   ;;  %v4733_v57 = vld [vmem:[#allocation5 + $0x210] ss:$20 sps:$4 sm:$0xff]   ;;  %v5493_v5 = vcombine.low %v81_v46, %v81_v46 }
  0x5d   :  { %1419 = vmatprep.subr.bf16.mxu0 %v4680_v20  ;;  %1542 = vmatprep.subr.bf16.mxu1 %v4682_v21  ;;  %v4732_v56 = vld [vmem:[#allocation5 + $0x208] ss:$20 sps:$4 sm:$0xff]   ;;  %v4738_v60 = vld [vmem:[#allocation5 + $0x230] ss:$20 sps:$4 sm:$0xff]   ;;  %v4739_v61 = vld [vmem:[#allocation5 + $0x238] ss:$20 sps:$4 sm:$0xff]  }
  0x5e   :  { %1441 = vmatprep.mubr.bf16.mxu0 %v5489_v48  ;;  %1564 = vmatprep.mubr.bf16.mxu1 %v5489_v48  ;;  %v4734_v58 = vld [vmem:[#allocation5 + $0x234] ss:$20 sps:$4 sm:$0xff]   ;;  %v4736_v59 = vld [vmem:[#allocation5 + $0x23c] ss:$20 sps:$4 sm:$0xff]   ;;  %v4742_v63 = vld [vmem:[#allocation5 + $0x264] ss:$20 sps:$4 sm:$0xff]  }
  0x5f   :  { %v4740_v62 = vld [vmem:[#allocation5 + $0x25c] ss:$20 sps:$4 sm:$0xff]   ;;  %v4744_v0 = vld [vmem:[#allocation5 + $0x258] ss:$20 sps:$4 sm:$0xff]   ;;  %v4745_v1 = vld [vmem:[#allocation5 + $0x260] ss:$20 sps:$4 sm:$0xff]  }
  0x60   :  { %1420 = vmatpush1.bf16.msra.mxu0 %v4684_v22  ;;  %1543 = vmatpush1.bf16.msra.mxu1 %v4685_v23  ;;  %v4749_v2 = vld [vmem:[#allocation5 + $0x284] ss:$20 sps:$4 sm:$0xff]   ;;  %v4752_v3 = vld [vmem:[#allocation5 + $0x28c] ss:$20 sps:$4 sm:$0xff]   ;;  %v4750_v6 = vld [vmem:[#allocation5 + $0x288] ss:$20 sps:$4 sm:$0xff]  }
  0x61   :  { %1421 = vmatprep.subr.bf16.mxu0 %v4686_v24  ;;  %1544 = vmatprep.subr.bf16.mxu1 %v4688_v25  ;;  %v4747_v4 = vld [vmem:[#allocation5 + $0x280] ss:$20 sps:$4 sm:$0xff]   ;;  %v4754_v9 = vld [vmem:[#allocation5 + $0x2a8] ss:$20 sps:$4 sm:$0xff]   ;;  %v4757_v10 = vld [vmem:[#allocation5 + $0x2b0] ss:$20 sps:$4 sm:$0xff]  }
  0x62   :  { %v4756_v7 = vld [vmem:[#allocation5 + $0x2ac] ss:$20 sps:$4 sm:$0xff]   ;;  %v4759_v8 = vld [vmem:[#allocation5 + $0x2b4] ss:$20 sps:$4 sm:$0xff]   ;;  %v4765_v12 = vld [vmem:[#allocation5 + $0x2dc] ss:$20 sps:$4 sm:$0xff]  }
  0x63   :  { %v4762_v11 = vld [vmem:[#allocation5 + $0x2d4] ss:$20 sps:$4 sm:$0xff]   ;;  %v4760_v13 = vld [vmem:[#allocation5 + $0x2d0] ss:$20 sps:$4 sm:$0xff]   ;;  %v4763_v14 = vld [vmem:[#allocation5 + $0x2d8] ss:$20 sps:$4 sm:$0xff]  }
  0x64   :  { %1422 = vmatpush1.bf16.msra.mxu0 %v4690_v26  ;;  %1545 = vmatpush1.bf16.msra.mxu1 %v4691_v27  ;;  %v4768_v15 = vld [vmem:[#allocation5 + $0x2fc] ss:$20 sps:$4 sm:$0xff]   ;;  %v4771_v16 = vld [vmem:[#allocation5 + $0x304] ss:$20 sps:$4 sm:$0xff]   ;;  %v4769_v18 = vld [vmem:[#allocation5 + $0x300] ss:$20 sps:$4 sm:$0xff]  }
  0x65   :  { %1423 = vmatprep.subr.bf16.mxu0 %v4692_v28  ;;  %1546 = vmatprep.subr.bf16.mxu1 %v4694_v29  ;;  %v4766_v17 = vld [vmem:[#allocation5 + $0x2f8] ss:$20 sps:$4 sm:$0xff]   ;;  %v4772_v21 = vld [vmem:[#allocation5 + $0x320] ss:$20 sps:$4 sm:$0xff]   ;;  %v4775_v22 = vld [vmem:[#allocation5 + $0x328] ss:$20 sps:$4 sm:$0xff]  }
  0x66   :  { %v4774_v19 = vld [vmem:[#allocation5 + $0x324] ss:$20 sps:$4 sm:$0xff]   ;;  %v4777_v20 = vld [vmem:[#allocation5 + $0x32c] ss:$20 sps:$4 sm:$0xff]   ;;  %v4783_v24 = vld [vmem:[#allocation5 + $0x354] ss:$20 sps:$4 sm:$0xff]  }
  0x67   :  { %v4780_v23 = vld [vmem:[#allocation5 + $0x34c] ss:$20 sps:$4 sm:$0xff]   ;;  %v4778_v25 = vld [vmem:[#allocation5 + $0x348] ss:$20 sps:$4 sm:$0xff]   ;;  %v4781_v26 = vld [vmem:[#allocation5 + $0x350] ss:$20 sps:$4 sm:$0xff]  }
  0x68   :  { %1424 = vmatpush1.bf16.msra.mxu0 %v4696_v30  ;;  %1547 = vmatpush1.bf16.msra.mxu1 %v4697_v31  ;;  %v4786_v27 = vld [vmem:[#allocation5 + $0x374] ss:$20 sps:$4 sm:$0xff]   ;;  %v4789_v28 = vld [vmem:[#allocation5 + $0x37c] ss:$20 sps:$4 sm:$0xff]   ;;  %s5394_s29 = smov [#allocation10]  }
  0x69   :  { %1425 = vmatprep.subr.bf16.mxu0 %v4698_v32  ;;  %1548 = vmatprep.subr.bf16.mxu1 %v4700_v33  ;;  %v5497_v29 = vld [vmem:[#allocation2 + $0x8] sm:$0xff]  ;;  %v4784_v31 = vld [vmem:[#allocation5 + $0x370] ss:$20 sps:$4 sm:$0xff]   ;;  %s3922_s30 = sshll.u32 %s5394_s29, 4  ;;  %s3923_s30 = int_to_ptr.vmem [resolvable:$true] %s3922_s30 }
  0x6a   :  { %v5501_v30 = vcombine.high %v5497_v29, %v5497_v29  ;;  %v4787_v32 = vld [vmem:[#allocation5 + $0x378] ss:$20 sps:$4 sm:$0xff]   ;;  %v4792_v33 = vld [vmem:[#allocation5 + $0x39c] ss:$20 sps:$4 sm:$0xff]   ;;  %p5358_p5 = scmp.lt.s32.totalorder %s3923_s30, %s3923_s30 }
  0x6b   :  { %v4813_v46 = vld [vmem:[#allocation5 + $0x41c] ss:$20 sps:$4 sm:$0xff]  }
  0x6c   :  { %1426 = vmatpush1.bf16.msra.mxu0 %v4702_v34  ;;  %1549 = vmatpush1.bf16.msra.mxu1 %v4703_v35  ;;  %v4795_v34 = vld [vmem:[#allocation5 + $0x3a4] ss:$20 sps:$4 sm:$0xff]  }
  0x6d   :  { %1427 = vmatprep.subr.bf16.mxu0 %v4704_v36  ;;  %1550 = vmatprep.subr.bf16.mxu1 %v4706_v37  ;;  %v4790_v35 = vld [vmem:[#allocation5 + $0x398] ss:$20 sps:$4 sm:$0xff]   ;;  %v4793_v36 = vld [vmem:[#allocation5 + $0x3a0] ss:$20 sps:$4 sm:$0xff]  }
  0x6e   :  { %v4798_v37 = vld [vmem:[#allocation5 + $0x3c4] ss:$20 sps:$4 sm:$0xff]  }
  0x70   :  { %1428 = vmatpush1.bf16.msra.mxu0 %v4708_v38  ;;  %1551 = vmatpush1.bf16.msra.mxu1 %v4709_v39  ;;  %v4801_v38 = vld [vmem:[#allocation5 + $0x3cc] ss:$20 sps:$4 sm:$0xff]  }
  0x71   :  { %1429 = vmatprep.subr.bf16.mxu0 %v4710_v40  ;;  %1552 = vmatprep.subr.bf16.mxu1 %v4712_v41  ;;  %v4796_v39 = vld [vmem:[#allocation5 + $0x3c0] ss:$20 sps:$4 sm:$0xff]   ;;  %v4799_v40 = vld [vmem:[#allocation5 + $0x3c8] ss:$20 sps:$4 sm:$0xff]  }
  0x72   :  { %v4804_v41 = vld [vmem:[#allocation5 + $0x3ec] ss:$20 sps:$4 sm:$0xff]  }
  0x74   :  { %1430 = vmatpush1.bf16.msra.mxu0 %v4714_v42  ;;  %1553 = vmatpush1.bf16.msra.mxu1 %v4715_v43  ;;  %v4807_v42 = vld [vmem:[#allocation5 + $0x3f4] ss:$20 sps:$4 sm:$0xff]  }
  0x75   :  { %1431 = vmatprep.subr.bf16.mxu0 %v4716_v44  ;;  %1554 = vmatprep.subr.bf16.mxu1 %v4718_v45  ;;  %v4802_v43 = vld [vmem:[#allocation5 + $0x3e8] ss:$20 sps:$4 sm:$0xff]   ;;  %v4805_v44 = vld [vmem:[#allocation5 + $0x3f0] ss:$20 sps:$4 sm:$0xff]  }
  0x76   :  { %v4810_v45 = vld [vmem:[#allocation5 + $0x414] ss:$20 sps:$4 sm:$0xff]  }
  0x78   :  { %1432 = vmatpush1.bf16.msra.mxu0 %v4720_v47  ;;  %1555 = vmatpush1.bf16.msra.mxu1 %v4721_v49  ;;  %v4808_v47 = vld [vmem:[#allocation5 + $0x410] ss:$20 sps:$4 sm:$0xff]   ;;  %v4811_v49 = vld [vmem:[#allocation5 + $0x418] ss:$20 sps:$4 sm:$0xff]  }
  0x79   :  { %1433 = vmatprep.subr.bf16.mxu0 %v4722_v50  ;;  %1556 = vmatprep.subr.bf16.mxu1 %v4724_v51  ;;  %v4816_v50 = vld [vmem:[#allocation5 + $0x43c] ss:$20 sps:$4 sm:$0xff]   ;;  %v4819_v51 = vld [vmem:[#allocation5 + $0x444] ss:$20 sps:$4 sm:$0xff]  }
  0x7c   :  { %1434 = vmatpush1.bf16.msra.mxu0 %v4726_v52  ;;  %1557 = vmatpush1.bf16.msra.mxu1 %v4727_v53  ;;  %v4814_v52 = vld [vmem:[#allocation5 + $0x438] ss:$20 sps:$4 sm:$0xff]   ;;  %v4817_v53 = vld [vmem:[#allocation5 + $0x440] ss:$20 sps:$4 sm:$0xff]  }
  0x7d   :  { %1435 = vmatprep.subr.bf16.mxu0 %v4728_v54  ;;  %1558 = vmatprep.subr.bf16.mxu1 %v4730_v55  ;;  %v4822_v54 = vld [vmem:[#allocation5 + $0x464] ss:$20 sps:$4 sm:$0xff]   ;;  %v4825_v55 = vld [vmem:[#allocation5 + $0x46c] ss:$20 sps:$4 sm:$0xff]  }
  0x80   :  { %1436 = vmatpush1.bf16.msra.mxu0 %v4732_v56  ;;  %1559 = vmatpush1.bf16.msra.mxu1 %v4733_v57  ;;  %v4820_v56 = vld [vmem:[#allocation5 + $0x460] ss:$20 sps:$4 sm:$0xff]   ;;  %v4823_v57 = vld [vmem:[#allocation5 + $0x468] ss:$20 sps:$4 sm:$0xff]  }
  0x81   :  { %1437 = vmatprep.subr.bf16.mxu0 %v4734_v58  ;;  %1560 = vmatprep.subr.bf16.mxu1 %v4736_v59  ;;  %v4828_v58 = vld [vmem:[#allocation5 + $0x48c] ss:$20 sps:$4 sm:$0xff]   ;;  %v4831_v59 = vld [vmem:[#allocation5 + $0x494] ss:$20 sps:$4 sm:$0xff]  }
  0x84   :  { %1438 = vmatpush1.bf16.msra.mxu0 %v4738_v60  ;;  %1561 = vmatpush1.bf16.msra.mxu1 %v4739_v61  ;;  %v4826_v60 = vld [vmem:[#allocation5 + $0x488] ss:$20 sps:$4 sm:$0xff]   ;;  %v4829_v61 = vld [vmem:[#allocation5 + $0x490] ss:$20 sps:$4 sm:$0xff]  }
  0x85   :  { %1439 = vmatprep.subr.bf16.mxu0 %v4740_v62  ;;  %1562 = vmatprep.subr.bf16.mxu1 %v4742_v63  ;;  %v4834_v62 = vld [vmem:[#allocation5 + $0x4b4] ss:$20 sps:$4 sm:$0xff]   ;;  %v4837_v63 = vld [vmem:[#allocation5 + $0x4bc] ss:$20 sps:$4 sm:$0xff]  }
  0x88   :  { %1440 = vmatpush1.bf16.msra.mxu0 %v4744_v0  ;;  %1563 = vmatpush1.bf16.msra.mxu1 %v4745_v1  ;;  %v4832_v0 = vld [vmem:[#allocation5 + $0x4b0] ss:$20 sps:$4 sm:$0xff]   ;;  %v4835_v1 = vld [vmem:[#allocation5 + $0x4b8] ss:$20 sps:$4 sm:$0xff]  }
  0x89   :  { %1450 = vmatprep.subr.bf16.mxu0 %v4749_v2  ;;  %1573 = vmatprep.subr.bf16.mxu1 %v4752_v3  ;;  %v4840_v2 = vld [vmem:[#allocation5 + $0x4dc] ss:$20 sps:$4 sm:$0xff]   ;;  %v4843_v3 = vld [vmem:[#allocation5 + $0x4e4] ss:$20 sps:$4 sm:$0xff]  }
  0x8b   :  { %1442 = vmatmul.mubr.bf16.vlgmr.msra.gmra.mrb[0].mxu0 %v5493_v5  ;;  %1565 = vmatmul.mubr.bf16.vlgmr.msra.gmra.mrb[0].mxu1 %v5493_v5 }
  0x8c   :  { %1451 = vmatpush1.bf16.msra.mxu0 %v4747_v4  ;;  %1574 = vmatpush1.bf16.msra.mxu1 %v4750_v6  ;;  %v4838_v4 = vld [vmem:[#allocation5 + $0x4d8] ss:$20 sps:$4 sm:$0xff]   ;;  %v4841_v6 = vld [vmem:[#allocation5 + $0x4e0] ss:$20 sps:$4 sm:$0xff]  }
  0x8d   :  { %1452 = vmatprep.subr.bf16.mxu0 %v4756_v7  ;;  %1575 = vmatprep.subr.bf16.mxu1 %v4759_v8  ;;  %v4848_v7 = vld [vmem:[#allocation5 + $0x504] ss:$20 sps:$4 sm:$0xff]   ;;  %v4851_v8 = vld [vmem:[#allocation5 + $0x50c] ss:$20 sps:$4 sm:$0xff]  }
  0x8e   :  { %1482 = vmatprep.mubr.bf16.mxu0 %v5501_v30  ;;  %1605 = vmatprep.mubr.bf16.mxu1 %v5501_v30 }
  0x90   :  { %1453 = vmatpush1.bf16.msra.mxu0 %v4754_v9  ;;  %1576 = vmatpush1.bf16.msra.mxu1 %v4757_v10  ;;  %v4846_v9 = vld [vmem:[#allocation5 + $0x500] ss:$20 sps:$4 sm:$0xff]   ;;  %v5507_v10 = vcombine.low %v5497_v29, %v5497_v29 }
  0x91   :  { %1454 = vmatprep.subr.bf16.mxu0 %v4762_v11  ;;  %1577 = vmatprep.subr.bf16.mxu1 %v4765_v12  ;;  %v4849_v11 = vld [vmem:[#allocation5 + $0x508] ss:$20 sps:$4 sm:$0xff]   ;;  %v4854_v12 = vld [vmem:[#allocation5 + $0x52c] ss:$20 sps:$4 sm:$0xff]  }
  0x92   :  { %v4878_v29 = vld [vmem:[#allocation5 + $0x5cc] ss:$20 sps:$4 sm:$0xff]  }
  0x94   :  { %1455 = vmatpush1.bf16.msra.mxu0 %v4760_v13  ;;  %1578 = vmatpush1.bf16.msra.mxu1 %v4763_v14  ;;  %v4857_v13 = vld [vmem:[#allocation5 + $0x534] ss:$20 sps:$4 sm:$0xff]  }
  0x95   :  { %1456 = vmatprep.subr.bf16.mxu0 %v4768_v15  ;;  %1579 = vmatprep.subr.bf16.mxu1 %v4771_v16  ;;  %v4852_v14 = vld [vmem:[#allocation5 + $0x528] ss:$20 sps:$4 sm:$0xff]   ;;  %v4855_v15 = vld [vmem:[#allocation5 + $0x530] ss:$20 sps:$4 sm:$0xff]  }
  0x96   :  { %v4860_v16 = vld [vmem:[#allocation5 + $0x554] ss:$20 sps:$4 sm:$0xff]  }
  0x98   :  { %1457 = vmatpush1.bf16.msra.mxu0 %v4766_v17  ;;  %1580 = vmatpush1.bf16.msra.mxu1 %v4769_v18  ;;  %v4863_v17 = vld [vmem:[#allocation5 + $0x55c] ss:$20 sps:$4 sm:$0xff]  }
  0x99   :  { %1458 = vmatprep.subr.bf16.mxu0 %v4774_v19  ;;  %1581 = vmatprep.subr.bf16.mxu1 %v4777_v20  ;;  %v4858_v18 = vld [vmem:[#allocation5 + $0x550] ss:$20 sps:$4 sm:$0xff]   ;;  %v5391_v19 = vmov 0   ;;  %v4861_v20 = vld [vmem:[#allocation5 + $0x558] ss:$20 sps:$4 sm:$0xff]  }
  0x9c   :  { %1459 = vmatpush1.bf16.msra.mxu0 %v4772_v21  ;;  %1582 = vmatpush1.bf16.msra.mxu1 %v4775_v22  ;;  %v4866_v21 = vld [vmem:[#allocation5 + $0x57c] ss:$20 sps:$4 sm:$0xff]   ;;  %v4869_v22 = vld [vmem:[#allocation5 + $0x584] ss:$20 sps:$4 sm:$0xff]  }
  0x9d   :  { %1460 = vmatprep.subr.bf16.mxu0 %v4780_v23  ;;  %1583 = vmatprep.subr.bf16.mxu1 %v4783_v24  ;;  %v4864_v23 = vld [vmem:[#allocation5 + $0x578] ss:$20 sps:$4 sm:$0xff]   ;;  %v4867_v24 = vld [vmem:[#allocation5 + $0x580] ss:$20 sps:$4 sm:$0xff]  }
  0xa0   :  { %1461 = vmatpush1.bf16.msra.mxu0 %v4778_v25  ;;  %1584 = vmatpush1.bf16.msra.mxu1 %v4781_v26  ;;  %v4872_v25 = vld [vmem:[#allocation5 + $0x5a4] ss:$20 sps:$4 sm:$0xff]   ;;  %v4875_v26 = vld [vmem:[#allocation5 + $0x5ac] ss:$20 sps:$4 sm:$0xff]  }
  0xa1   :  { %1462 = vmatprep.subr.bf16.mxu0 %v4786_v27  ;;  %1585 = vmatprep.subr.bf16.mxu1 %v4789_v28  ;;  %v4870_v27 = vld [vmem:[#allocation5 + $0x5a0] ss:$20 sps:$4 sm:$0xff]   ;;  %v4873_v28 = vld [vmem:[#allocation5 + $0x5a8] ss:$20 sps:$4 sm:$0xff]  }
  0xa4   :  { %1463 = vmatpush1.bf16.msra.mxu0 %v4784_v31  ;;  %1586 = vmatpush1.bf16.msra.mxu1 %v4787_v32  ;;  %v4881_v31 = vld [vmem:[#allocation5 + $0x5d4] ss:$20 sps:$4 sm:$0xff]  }
  0xa5   :  { %1464 = vmatprep.subr.bf16.mxu0 %v4792_v33  ;;  %1587 = vmatprep.subr.bf16.mxu1 %v4795_v34  ;;  %v4876_v32 = vld [vmem:[#allocation5 + $0x5c8] ss:$20 sps:$4 sm:$0xff]   ;;  %v4879_v33 = vld [vmem:[#allocation5 + $0x5d0] ss:$20 sps:$4 sm:$0xff]  }
  0xa6   :  { %v4884_v34 = vld [vmem:[#allocation5 + $0x5f4] ss:$20 sps:$4 sm:$0xff]  }
  0xa8   :  { %1465 = vmatpush1.bf16.msra.mxu0 %v4790_v35  ;;  %1588 = vmatpush1.bf16.msra.mxu1 %v4793_v36  ;;  %v4887_v35 = vld [vmem:[#allocation5 + $0x5fc] ss:$20 sps:$4 sm:$0xff]  }
  0xa9   :  { %1466 = vmatprep.subr.bf16.mxu0 %v4798_v37  ;;  %1589 = vmatprep.subr.bf16.mxu1 %v4801_v38  ;;  %v4882_v36 = vld [vmem:[#allocation5 + $0x5f0] ss:$20 sps:$4 sm:$0xff]   ;;  %v4885_v37 = vld [vmem:[#allocation5 + $0x5f8] ss:$20 sps:$4 sm:$0xff]  }
  0xaa   :  { %v4890_v38 = vld [vmem:[#allocation5 + $0x61c] ss:$20 sps:$4 sm:$0xff]  }
  0xac   :  { %1467 = vmatpush1.bf16.msra.mxu0 %v4796_v39  ;;  %1590 = vmatpush1.bf16.msra.mxu1 %v4799_v40  ;;  %v4893_v39 = vld [vmem:[#allocation5 + $0x624] ss:$20 sps:$4 sm:$0xff]  }
  0xad   :  { %1468 = vmatprep.subr.bf16.mxu0 %v4804_v41  ;;  %1591 = vmatprep.subr.bf16.mxu1 %v4807_v42  ;;  %v4888_v40 = vld [vmem:[#allocation5 + $0x618] ss:$20 sps:$4 sm:$0xff]   ;;  %v4891_v41 = vld [vmem:[#allocation5 + $0x620] ss:$20 sps:$4 sm:$0xff]   ;;  %v4895_v42 = vld [vmem:[#allocation5 + $0x150] ss:$20 sps:$4 sm:$0xff]  }
  0xb0   :  { %1469 = vmatpush1.bf16.msra.mxu0 %v4802_v43  ;;  %1592 = vmatpush1.bf16.msra.mxu1 %v4805_v44  ;;  %v4909_v43 = vld [vmem:[#allocation5 + $0x3d0] ss:$20 sps:$4 sm:$0xff]   ;;  %v5513_v44 = vld [vmem:[#allocation2 + $0x10] ss:$0 sps:$4 sm:$0xff]  }
  0xb1   :  { %1470 = vmatprep.subr.bf16.mxu0 %v4810_v45  ;;  %1593 = vmatprep.subr.bf16.mxu1 %v4813_v46  ;;  %v4896_v45 = vld [vmem:[#allocation5 + $0x10] ss:$20 sps:$4 sm:$0xff]   ;;  %v4897_v46 = vld [vmem:[#allocation5 + $0x178] ss:$20 sps:$4 sm:$0xff]  }
  0xb4   :  { %1471 = vmatpush1.bf16.msra.mxu0 %v4808_v47  ;;  %1594 = vmatpush1.bf16.msra.mxu1 %v4811_v49  ;;  %v4911_v47 = vld [vmem:[#allocation5 + $0x290] ss:$20 sps:$4 sm:$0xff]   ;;  %v4913_v49 = vld [vmem:[#allocation5 + $0x3f8] ss:$20 sps:$4 sm:$0xff]  }
  0xb5   :  { %1472 = vmatprep.subr.bf16.mxu0 %v4816_v50  ;;  %1595 = vmatprep.subr.bf16.mxu1 %v4819_v51  ;;  %v4898_v50 = vld [vmem:[#allocation5 + $0x38] ss:$20 sps:$4 sm:$0xff]   ;;  %v4899_v51 = vld [vmem:[#allocation5 + $0x1a0] ss:$20 sps:$4 sm:$0xff]  }
  0xb8   :  { %1473 = vmatpush1.bf16.msra.mxu0 %v4814_v52  ;;  %1596 = vmatpush1.bf16.msra.mxu1 %v4817_v53  ;;  %v4914_v52 = vld [vmem:[#allocation5 + $0x2b8] ss:$20 sps:$4 sm:$0xff]   ;;  %v4916_v53 = vld [vmem:[#allocation5 + $0x420] ss:$20 sps:$4 sm:$0xff]  }
  0xb9   :  { %1474 = vmatprep.subr.bf16.mxu0 %v4822_v54  ;;  %1597 = vmatprep.subr.bf16.mxu1 %v4825_v55  ;;  %v4900_v54 = vld [vmem:[#allocation5 + $0x60] ss:$20 sps:$4 sm:$0xff]   ;;  %v4901_v55 = vld [vmem:[#allocation5 + $0x1c8] ss:$20 sps:$4 sm:$0xff]  }
  0xbc   :  { %1475 = vmatpush1.bf16.msra.mxu0 %v4820_v56  ;;  %1598 = vmatpush1.bf16.msra.mxu1 %v4823_v57  ;;  %v4917_v56 = vld [vmem:[#allocation5 + $0x2e0] ss:$20 sps:$4 sm:$0xff]   ;;  %v4919_v57 = vld [vmem:[#allocation5 + $0x448] ss:$20 sps:$4 sm:$0xff]  }
  0xbd   :  { %1476 = vmatprep.subr.bf16.mxu0 %v4828_v58  ;;  %1599 = vmatprep.subr.bf16.mxu1 %v4831_v59  ;;  %v4902_v58 = vld [vmem:[#allocation5 + $0x88] ss:$20 sps:$4 sm:$0xff]   ;;  %v4903_v59 = vld [vmem:[#allocation5 + $0x1f0] ss:$20 sps:$4 sm:$0xff]  }
  0xc0   :  { %1477 = vmatpush1.bf16.msra.mxu0 %v4826_v60  ;;  %1600 = vmatpush1.bf16.msra.mxu1 %v4829_v61  ;;  %v4920_v60 = vld [vmem:[#allocation5 + $0x308] ss:$20 sps:$4 sm:$0xff]   ;;  %v4922_v61 = vld [vmem:[#allocation5 + $0x470] ss:$20 sps:$4 sm:$0xff]  }
  0xc1   :  { %1478 = vmatprep.subr.bf16.mxu0 %v4834_v62  ;;  %1601 = vmatprep.subr.bf16.mxu1 %v4837_v63  ;;  %v4904_v62 = vld [vmem:[#allocation5 + $0xb0] ss:$20 sps:$4 sm:$0xff]   ;;  %v4925_v63 = vld [vmem:[#allocation5 + $0x498] ss:$20 sps:$4 sm:$0xff]  }
  0xc4   :  { %1479 = vmatpush1.bf16.msra.mxu0 %v4832_v0  ;;  %1602 = vmatpush1.bf16.msra.mxu1 %v4835_v1  ;;  %v4906_v0 = vld [vmem:[#allocation5 + $0xd8] ss:$20 sps:$4 sm:$0xff]   ;;  %v4907_v1 = vld [vmem:[#allocation5 + $0x240] ss:$20 sps:$4 sm:$0xff]  }
  0xc5   :  { %1480 = vmatprep.subr.bf16.mxu0 %v4840_v2  ;;  %1603 = vmatprep.subr.bf16.mxu1 %v4843_v3  ;;  %v4926_v2 = vld [vmem:[#allocation5 + $0x358] ss:$20 sps:$4 sm:$0xff]   ;;  %v4928_v3 = vld [vmem:[#allocation5 + $0x4c0] ss:$20 sps:$4 sm:$0xff]  }
  0xc8   :  { %1481 = vmatpush1.bf16.msra.mxu0 %v4838_v4  ;;  %1604 = vmatpush1.bf16.msra.mxu1 %v4841_v6  ;;  %v4908_v4 = vld [vmem:[#allocation5 + $0x100] ss:$20 sps:$4 sm:$0xff]  }
  0xc9   :  { %1491 = vmatprep.subr.bf16.mxu0 %v4848_v7  ;;  %1614 = vmatprep.subr.bf16.mxu1 %v4851_v8  ;;  %v4929_v6 = vld [vmem:[#allocation5 + $0x380] ss:$20 sps:$4 sm:$0xff]   ;;  %v4910_v7 = vld [vmem:[#allocation5 + $0x268] ss:$20 sps:$4 sm:$0xff]  }
  0xca   :  { %v4931_v8 = vld [vmem:[#allocation5 + $0x4e8] ss:$20 sps:$4 sm:$0xff]  }
  0xcb   :  { %1483 = vmatmul.mubr.bf16.vlgmr.msra.gmra.mrb[0].mxu0 %v5507_v10  ;;  %1606 = vmatmul.mubr.bf16.vlgmr.msra.gmra.mrb[0].mxu1 %v5507_v10 }
  0xcc   :  { %1492 = vmatpush1.bf16.msra.mxu0 %v4846_v9  ;;  %1615 = vmatpush1.bf16.msra.mxu1 %v4849_v11  ;;  %v4912_v9 = vld [vmem:[#allocation5 + $0x128] ss:$20 sps:$4 sm:$0xff]  }
  0xcd   :  { %1493 = vmatprep.subr.bf16.mxu0 %v4854_v12  ;;  %1616 = vmatprep.subr.bf16.mxu1 %v4857_v13  ;;  %v4932_v11 = vld [vmem:[#allocation5 + $0x3a8] ss:$20 sps:$4 sm:$0xff]   ;;  %v4937_v12 = vld [vmem:[#allocation7 + $0x4] ss:$20 sps:$4 sm:$0xff]  }
  0xce   :  { %1523 = vmatprep.mubr.bf16.mxu0 %v5391_v19  ;;  %1646 = vmatprep.mubr.bf16.mxu1 %v5391_v19  ;;  %v4915_v13 = vld [vmem:[#allocation5 + $0x510] ss:$20 sps:$4 sm:$0xff]  }
  0xd0   :  { %1494 = vmatpush1.bf16.msra.mxu0 %v4852_v14  ;;  %1617 = vmatpush1.bf16.msra.mxu1 %v4855_v15  ;;  %v4935_v14 = vld [vmem:[#allocation7] ss:$20 sps:$4 sm:$0xff]  }
  0xd1   :  { %1495 = vmatprep.subr.bf16.mxu0 %v4860_v16  ;;  %1618 = vmatprep.subr.bf16.mxu1 %v4863_v17  ;;  %v4943_v15 = vld [vmem:[#allocation7 + $0x2c] ss:$20 sps:$4 sm:$0xff]   ;;  %v5392_v16 = vmov 0.0  }
  0xd2   :  { %v4918_v17 = vld [vmem:[#allocation5 + $0x538] ss:$20 sps:$4 sm:$0xff]  }
  0xd4   :  { %1496 = vmatpush1.bf16.msra.mxu0 %v4858_v18  ;;  %1619 = vmatpush1.bf16.msra.mxu1 %v4861_v20  ;;  %v4941_v18 = vld [vmem:[#allocation7 + $0x28] ss:$20 sps:$4 sm:$0xff]  }
  0xd5   :  { %1497 = vmatprep.subr.bf16.mxu0 %v4866_v21  ;;  %1620 = vmatprep.subr.bf16.mxu1 %v4869_v22  ;;  %v4949_v20 = vld [vmem:[#allocation7 + $0x54] ss:$20 sps:$4 sm:$0xff]   ;;  %v4947_v22 = vld [vmem:[#allocation7 + $0x50] ss:$20 sps:$4 sm:$0xff]  }
  0xd6   :  { %v4921_v21 = vld [vmem:[#allocation5 + $0x560] ss:$20 sps:$4 sm:$0xff]  }
  0xd8   :  { %1498 = vmatpush1.bf16.msra.mxu0 %v4864_v23  ;;  %1621 = vmatpush1.bf16.msra.mxu1 %v4867_v24  ;;  %v4955_v23 = vld [vmem:[#allocation7 + $0x7c] ss:$20 sps:$4 sm:$0xff]   ;;  %v4961_v24 = vld [vmem:[#allocation7 + $0xa4] ss:$20 sps:$4 sm:$0xff]  }
  0xd9   :  { %1499 = vmatprep.subr.bf16.mxu0 %v4872_v25  ;;  %1622 = vmatprep.subr.bf16.mxu1 %v4875_v26  ;;  %v4927_v25 = vld [vmem:[#allocation5 + $0x5b0] ss:$20 sps:$4 sm:$0xff]   ;;  %v4959_v26 = vld [vmem:[#allocation7 + $0xa0] ss:$20 sps:$4 sm:$0xff]  }
  0xdc   :  { %1500 = vmatpush1.bf16.msra.mxu0 %v4870_v27  ;;  %1623 = vmatpush1.bf16.msra.mxu1 %v4873_v28  ;;  %v4967_v27 = vld [vmem:[#allocation7 + $0xcc] ss:$20 sps:$4 sm:$0xff]  }
  0xdd   :  { %1501 = vmatprep.subr.bf16.mxu0 %v4878_v29  ;;  %1624 = vmatprep.subr.bf16.mxu1 %v4881_v31  ;;  %v4930_v28 = vld [vmem:[#allocation5 + $0x5d8] ss:$20 sps:$4 sm:$0xff]   ;;  %v4965_v29 = vld [vmem:[#allocation7 + $0xc8] ss:$20 sps:$4 sm:$0xff]  }
  0xde   :  { %v4973_v31 = vld [vmem:[#allocation7 + $0xf4] ss:$20 sps:$4 sm:$0xff]  }
  0xe0   :  { %1502 = vmatpush1.bf16.msra.mxu0 %v4876_v32  ;;  %1625 = vmatpush1.bf16.msra.mxu1 %v4879_v33  ;;  %v4933_v32 = vld [vmem:[#allocation5 + $0x600] ss:$20 sps:$4 sm:$0xff]   ;;  %v4971_v33 = vld [vmem:[#allocation7 + $0xf0] ss:$20 sps:$4 sm:$0xff]  }
  0xe1   :  { %1503 = vmatprep.subr.bf16.mxu0 %v4884_v34  ;;  %1626 = vmatprep.subr.bf16.mxu1 %v4887_v35  ;;  %v4979_v34 = vld [vmem:[#allocation7 + $0x11c] ss:$20 sps:$4 sm:$0xff]  }
  0xe2   :  { %v4934_v35 = vld [vmem:[#allocation5 + $0x628] ss:$20 sps:$4 sm:$0xff]  }
  0xe4   :  { %1504 = vmatpush1.bf16.msra.mxu0 %v4882_v36  ;;  %1627 = vmatpush1.bf16.msra.mxu1 %v4885_v37  ;;  %v4940_v36 = vld [vmem:[#allocation7 + $0xc] ss:$20 sps:$4 sm:$0xff]  }
  0xe5   :  { %1505 = vmatprep.subr.bf16.mxu0 %v4890_v38  ;;  %1628 = vmatprep.subr.bf16.mxu1 %v4893_v39  ;;  %v4977_v37 = vld [vmem:[#allocation7 + $0x118] ss:$20 sps:$4 sm:$0xff]   ;;  %v4938_v39 = vld [vmem:[#allocation7 + $0x8] ss:$20 sps:$4 sm:$0xff]  }
  0xe6   :  { %v4985_v38 = vld [vmem:[#allocation7 + $0x144] ss:$20 sps:$4 sm:$0xff]  }
  0xe8   :  { %1506 = vmatpush1.bf16.msra.mxu0 %v4888_v40  ;;  %1629 = vmatpush1.bf16.msra.mxu1 %v4891_v41  ;;  %v4946_v40 = vld [vmem:[#allocation7 + $0x34] ss:$20 sps:$4 sm:$0xff]  }
  0xe9   :  { %4379 = vmatprep.subr.bf16.mxu0 %v4895_v42  ;;  %4401 = vmatprep.subr.bf16.mxu1 %v4909_v43  ;;  %v4983_v41 = vld [vmem:[#allocation7 + $0x140] ss:$20 sps:$4 sm:$0xff]   ;;  %v4944_v43 = vld [vmem:[#allocation7 + $0x30] ss:$20 sps:$4 sm:$0xff]  }
  0xea   :  { %v4991_v42 = vld [vmem:[#allocation7 + $0x16c] ss:$20 sps:$4 sm:$0xff]  }
  0xeb   :  { %1524 = vmatmul.mubr.bf16.vlgmr.msra.gmra.mrb[0].mxu0 %v5513_v44  ;;  %1647 = vmatmul.mubr.bf16.vlgmr.msra.gmra.mrb[0].mxu1 %v5513_v44 }
  0xec   :  { %4380 = vmatpush3.bf16.msra.mxu0 %v4896_v45  ;;  %4402 = vmatpush3.bf16.msra.mxu1 %v4911_v47  ;;  %v4952_v45 = vld [vmem:[#allocation7 + $0x5c] ss:$20 sps:$4 sm:$0xff]   ;;  %v4997_v47 = vld [vmem:[#allocation7 + $0x194] ss:$20 sps:$4 sm:$0xff]  }
  0xed   :  { %4381 = vmatprep.subr.bf16.mxu0 %v4897_v46  ;;  %4403 = vmatprep.subr.bf16.mxu1 %v4913_v49  ;;  %v4989_v46 = vld [vmem:[#allocation7 + $0x168] ss:$20 sps:$4 sm:$0xff]   ;;  %v4950_v49 = vld [vmem:[#allocation7 + $0x58] ss:$20 sps:$4 sm:$0xff]  }
  0xee   :  { %1687 = vmatprep.mubr.bf16.mxu0 %v5489_v48  ;;  %1727 = vmatprep.mubr.bf16.mxu1 %v5501_v30  ;;  %v4905_v48 = vld [vmem:[#allocation5 + $0x218] ss:$20 sps:$4 sm:$0xff]   ;;  %v4923_v30 = vld [vmem:[#allocation5 + $0x330] ss:$20 sps:$4 sm:$0xff]  }
  0xf0   :  { %4382 = vmatpush3.bf16.msra.mxu0 %v4898_v50  ;;  %4404 = vmatpush3.bf16.msra.mxu1 %v4914_v52  ;;  %v4958_v50 = vld [vmem:[#allocation7 + $0x84] ss:$20 sps:$4 sm:$0xff]   ;;  %v5003_v52 = vld [vmem:[#allocation7 + $0x1bc] ss:$20 sps:$4 sm:$0xff]  }
  0xf1   :  { %4383 = vmatprep.subr.bf16.mxu0 %v4899_v51  ;;  %4405 = vmatprep.subr.bf16.mxu1 %v4916_v53  ;;  %v4995_v51 = vld [vmem:[#allocation7 + $0x190] ss:$20 sps:$4 sm:$0xff]   ;;  %v4956_v53 = vld [vmem:[#allocation7 + $0x80] ss:$20 sps:$4 sm:$0xff]  }
  0xf4   :  { %4384 = vmatpush3.bf16.msra.mxu0 %v4900_v54  ;;  %4406 = vmatpush3.bf16.msra.mxu1 %v4917_v56  ;;  %v4964_v54 = vld [vmem:[#allocation7 + $0xac] ss:$20 sps:$4 sm:$0xff]   ;;  %v4962_v56 = vld [vmem:[#allocation7 + $0xa8] ss:$20 sps:$4 sm:$0xff]  }
  0xf5   :  { %4385 = vmatprep.subr.bf16.mxu0 %v4901_v55  ;;  %4407 = vmatprep.subr.bf16.mxu1 %v4919_v57  ;;  %v5001_v55 = vld [vmem:[#allocation7 + $0x1b8] ss:$20 sps:$4 sm:$0xff]   ;;  %v4970_v57 = vld [vmem:[#allocation7 + $0xd4] ss:$20 sps:$4 sm:$0xff]  }
  0xf8   :  { %4386 = vmatpush3.bf16.msra.mxu0 %v4902_v58  ;;  %4408 = vmatpush3.bf16.msra.mxu1 %v4920_v60  ;;  %v5007_v58 = vld [vmem:[#allocation7 + $0x1e0] ss:$20 sps:$4 sm:$0xff]   ;;  %v4968_v60 = vld [vmem:[#allocation7 + $0xd0] ss:$20 sps:$4 sm:$0xff]  }
  0xf9   :  { %4387 = vmatprep.subr.bf16.mxu0 %v4903_v59  ;;  %4409 = vmatprep.subr.bf16.mxu1 %v4922_v61  ;;  %v5015_v59 = vld [vmem:[#allocation7 + $0x20c] ss:$20 sps:$4 sm:$0xff]   ;;  %v4976_v61 = vld [vmem:[#allocation7 + $0xfc] ss:$20 sps:$4 sm:$0xff]  }
  0xfc   :  { %4388 = vmatpush3.bf16.msra.mxu0 %v4904_v62  ;;  %4410 = vmatpush3.bf16.msra.mxu1 %v4923_v30  ;;  %v5013_v62 = vld [vmem:[#allocation7 + $0x208] ss:$20 sps:$4 sm:$0xff]   ;;  %v4974_v30 = vld [vmem:[#allocation7 + $0xf8] ss:$20 sps:$4 sm:$0xff]  }
  0xfd   :  { %4389 = vmatprep.subr.bf16.mxu0 %v4905_v48  ;;  %4411 = vmatprep.subr.bf16.mxu1 %v4925_v63  ;;  %v5021_v48 = vld [vmem:[#allocation7 + $0x234] ss:$20 sps:$4 sm:$0xff]   ;;  %v4982_v63 = vld [vmem:[#allocation7 + $0x124] ss:$20 sps:$4 sm:$0xff]  }
 0x100   :  { %4390 = vmatpush3.bf16.msra.mxu0 %v4906_v0  ;;  %4412 = vmatpush3.bf16.msra.mxu1 %v4926_v2  ;;  %v5019_v0 = vld [vmem:[#allocation7 + $0x230] ss:$20 sps:$4 sm:$0xff]   ;;  %v4980_v2 = vld [vmem:[#allocation7 + $0x120] ss:$20 sps:$4 sm:$0xff]  }
 0x101   :  { %4391 = vmatprep.subr.bf16.mxu0 %v4907_v1  ;;  %4413 = vmatprep.subr.bf16.mxu1 %v4928_v3  ;;  %v5027_v1 = vld [vmem:[#allocation7 + $0x25c] ss:$20 sps:$4 sm:$0xff]   ;;  %v4988_v3 = vld [vmem:[#allocation7 + $0x14c] ss:$20 sps:$4 sm:$0xff]  }
 0x104   :  { %4392 = vmatpush3.bf16.msra.mxu0 %v4908_v4  ;;  %4414 = vmatpush3.bf16.msra.mxu1 %v4929_v6  ;;  %v5025_v4 = vld [vmem:[#allocation7 + $0x258] ss:$20 sps:$4 sm:$0xff]  }
 0x105   :  { %4393 = vmatprep.subr.bf16.mxu0 %v4910_v7  ;;  %4415 = vmatprep.subr.bf16.mxu1 %v4931_v8  ;;  %v5033_v6 = vld [vmem:[#allocation7 + $0x284] ss:$20 sps:$4 sm:$0xff]   ;;  %v4986_v7 = vld [vmem:[#allocation7 + $0x148] ss:$20 sps:$4 sm:$0xff]  }
 0x106   :  { %v4994_v8 = vld [vmem:[#allocation7 + $0x174] ss:$20 sps:$4 sm:$0xff]  }
 0x108   :  { %4394 = vmatpush3.bf16.msra.mxu0 %v4912_v9  ;;  %4416 = vmatpush3.bf16.msra.mxu1 %v4932_v11  ;;  %v4992_v9 = vld [vmem:[#allocation7 + $0x170] ss:$20 sps:$4 sm:$0xff]  }
 0x109   :  { %4538 = vmatprep.subr.bf16.mxu0 %v5392_v16  ;;  %3092 = vmatprep.subr.bf16.mxu1 %v4937_v12  ;;  %v5000_v11 = vld [vmem:[#allocation7 + $0x19c] ss:$20 sps:$4 sm:$0xff]   ;;  %v4998_v12 = vld [vmem:[#allocation7 + $0x198] ss:$20 sps:$4 sm:$0xff]  }
 0x10b   :  { %1688 = vmatmul.mubr.bf16.vlgmr.msra.gmra.mrb[4].mxu0 %v5493_v5  ;;  %1728 = vmatmul.mubr.bf16.vlgmr.msra.gmra.mrb[4].mxu1 %v5507_v10  ;;  %v4924_v5 = vld [vmem:[#allocation5 + $0x588] ss:$20 sps:$4 sm:$0xff]   ;;  %v4953_v10 = vld [vmem:[#allocation7 + $0x78] ss:$20 sps:$4 sm:$0xff]  }
 0x10c   :  { %4539 = vmatpush3.bf16.msra.mxu0 %v4915_v13  ;;  %4554 = vmatprep.mubr.msk.bf16.mxu0 %vm5393_vm0, %v5392_v16  ;;  %v5006_v13 = vld [vmem:[#allocation7 + $0x1c4] ss:$20 sps:$4 sm:$0xff]  }
 0x10d   :  { %4540 = vmatprep.subr.bf16.mxu0 %v5392_v16  ;;  %3093 = vmatpush1.bf16.msra.mxu1 %v4935_v14  ;;  %v5004_v14 = vld [vmem:[#allocation7 + $0x1c0] ss:$20 sps:$4 sm:$0xff]  }
 0x10e   :  { %3094 = vmatprep.subr.bf16.mxu1 %v4943_v15  ;;  %v5012_v15 = vld [vmem:[#allocation7 + $0x1ec] ss:$20 sps:$4 sm:$0xff]  }
 0x110   :  { %4541 = vmatpush3.bf16.msra.mxu0 %v4918_v17  ;;  %v5010_v17 = vld [vmem:[#allocation7 + $0x1e8] ss:$20 sps:$4 sm:$0xff]  }
 0x111   :  { %4542 = vmatprep.subr.bf16.mxu0 %v5392_v16  ;;  %3095 = vmatpush1.bf16.msra.mxu1 %v4941_v18  ;;  %v5018_v18 = vld [vmem:[#allocation7 + $0x214] ss:$20 sps:$4 sm:$0xff]  }
 0x112   :  { %3096 = vmatprep.subr.bf16.mxu1 %v4949_v20  ;;  %v5016_v20 = vld [vmem:[#allocation7 + $0x210] ss:$20 sps:$4 sm:$0xff]  }
 0x114   :  { %4543 = vmatpush3.bf16.msra.mxu0 %v4921_v21  ;;  %v5024_v21 = vld [vmem:[#allocation7 + $0x23c] ss:$20 sps:$4 sm:$0xff]  }
 0x115   :  { %4544 = vmatprep.subr.bf16.mxu0 %v5392_v16  ;;  %3097 = vmatpush1.bf16.msra.mxu1 %v4947_v22  ;;  %v5022_v22 = vld [vmem:[#allocation7 + $0x238] ss:$20 sps:$4 sm:$0xff]  }
 0x116   :  { %3098 = vmatprep.subr.bf16.mxu1 %v4955_v23  ;;  %v5030_v23 = vld [vmem:[#allocation7 + $0x264] ss:$20 sps:$4 sm:$0xff]  }
 0x118   :  { %4545 = vmatpush3.bf16.msra.mxu0 %v4924_v5  ;;  %v5028_v5 = vld [vmem:[#allocation7 + $0x260] ss:$20 sps:$4 sm:$0xff]  }
 0x119   :  { %4546 = vmatprep.subr.bf16.mxu0 %v5392_v16  ;;  %3099 = vmatpush1.bf16.msra.mxu1 %v4953_v10  ;;  %v5036_v10 = vld [vmem:[#allocation7 + $0x28c] ss:$20 sps:$4 sm:$0xff]  }
 0x11a   :  { %3100 = vmatprep.subr.bf16.mxu1 %v4961_v24  ;;  %v326_v24 = vlaneseq }
 0x11c   :  { %4547 = vmatpush3.bf16.msra.mxu0 %v4927_v25  ;;  %v5532_v25 = vshrl.u32 %v326_v24, 7 }
 0x11d   :  { %4548 = vmatprep.subr.bf16.mxu0 %v5392_v16  ;;  %3101 = vmatpush1.bf16.msra.mxu1 %v4959_v26 }
 0x11e   :  { %3102 = vmatprep.subr.bf16.mxu1 %v4967_v27  ;;  %v328_v26 = vsub.s32 0, %v5532_v25  ;;  %v5538_v27 = vld [vmem:[%s5642_s2] sm:$0x1f] }
 0x120   :  { %4549 = vmatpush3.bf16.msra.mxu0 %v4930_v28  ;;  %v332_v28 = vsub.s32 1, %v5532_v25 }
 0x121   :  { %4550 = vmatprep.subr.bf16.mxu0 %v5392_v16  ;;  %3103 = vmatpush1.bf16.msra.mxu1 %v4965_v29  ;;  %v340_v29 = vsub.s32 3, %v5532_v25 }
 0x122   :  { %3104 = vmatprep.subr.bf16.mxu1 %v4973_v31  ;;  %v329_v31 = vrot.slane %v5538_v27, %v328_v26 }
 0x124   :  { %4551 = vmatpush3.bf16.msra.mxu0 %v4933_v32  ;;  %v333_v32 = vrot.slane %v5538_v27, %v332_v28 }
 0x125   :  { %4552 = vmatprep.subr.bf16.mxu0 %v5392_v16  ;;  %3105 = vmatpush1.bf16.msra.mxu1 %v4971_v33  ;;  %v341_v33 = vrot.slane %v5538_v27, %v340_v29 }
 0x126   :  { %3106 = vmatprep.subr.bf16.mxu1 %v4979_v34 }
 0x128   :  { %4553 = vmatpush3.bf16.msra.mxu0 %v4934_v35 }
 0x129   :  { %3215 = vmatprep.subr.bf16.mxu0 %v4940_v36  ;;  %3107 = vmatpush1.bf16.msra.mxu1 %v4977_v37 }
 0x12a   :  { %3108 = vmatprep.subr.bf16.mxu1 %v4985_v38 }
 0x12b   :  { %4555 = vmatmul.mubr.bf16.vlgmr.msra.gmra.mrb[8].mxu0 %v5513_v44  ;;  %v5009_v44 = vld [vmem:[#allocation7 + $0x1e4] ss:$20 sps:$4 sm:$0xff]  }
 0x12c   :  { %3216 = vmatpush1.bf16.msra.mxu0 %v4938_v39 }
 0x12d   :  { %3217 = vmatprep.subr.bf16.mxu0 %v4946_v40  ;;  %3109 = vmatpush1.bf16.msra.mxu1 %v4983_v41 }
 0x12e   :  { %3110 = vmatprep.subr.bf16.mxu1 %v4991_v42 }
 0x130   :  { %3218 = vmatpush1.bf16.msra.mxu0 %v4944_v43 }
 0x131   :  { %3219 = vmatprep.subr.bf16.mxu0 %v4952_v45  ;;  %3111 = vmatpush1.bf16.msra.mxu1 %v4989_v46 }
 0x132   :  { %3112 = vmatprep.subr.bf16.mxu1 %v4997_v47 }
 0x134   :  { %3220 = vmatpush1.bf16.msra.mxu0 %v4950_v49 }
 0x135   :  { %3221 = vmatprep.subr.bf16.mxu0 %v4958_v50  ;;  %3113 = vmatpush1.bf16.msra.mxu1 %v4995_v51  ;;  %v5031_v51 = vld [vmem:[#allocation7 + $0x280] ss:$20 sps:$4 sm:$0xff]  }
 0x136   :  { %3114 = vmatprep.subr.bf16.mxu1 %v5003_v52  ;;  %v5034_v52 = vld [vmem:[#allocation7 + $0x288] ss:$20 sps:$4 sm:$0xff]  }
 0x138   :  { %3222 = vmatpush1.bf16.msra.mxu0 %v4956_v53 }
 0x139   :  { %3223 = vmatprep.subr.bf16.mxu0 %v4964_v54  ;;  %3115 = vmatpush1.bf16.msra.mxu1 %v5001_v55  ;;  %v5039_v54 = vld [vmem:[#allocation7 + $0x2ac] ss:$20 sps:$4 sm:$0xff]   ;;  %v5042_v55 = vld [vmem:[#allocation7 + $0x2b4] ss:$20 sps:$4 sm:$0xff]  }
 0x13a   :  { %3116 = vmatprep.subr.bf16.mxu1 %v5009_v44 }
 0x13c   :  { %3224 = vmatpush1.bf16.msra.mxu0 %v4962_v56  ;;  %v5037_v56 = vld [vmem:[#allocation7 + $0x2a8] ss:$20 sps:$4 sm:$0xff]  }
 0x13d   :  { %3225 = vmatprep.subr.bf16.mxu0 %v4970_v57  ;;  %3117 = vmatpush1.bf16.msra.mxu1 %v5007_v58  ;;  %v5040_v57 = vld [vmem:[#allocation7 + $0x2b0] ss:$20 sps:$4 sm:$0xff]   ;;  %v5045_v58 = vld [vmem:[#allocation7 + $0x2d4] ss:$20 sps:$4 sm:$0xff]  }
 0x13e   :  { %3118 = vmatprep.subr.bf16.mxu1 %v5015_v59  ;;  %v5048_v59 = vld [vmem:[#allocation7 + $0x2dc] ss:$20 sps:$4 sm:$0xff]  }
 0x140   :  { %3226 = vmatpush1.bf16.msra.mxu0 %v4968_v60  ;;  %v5043_v60 = vld [vmem:[#allocation7 + $0x2d0] ss:$20 sps:$4 sm:$0xff]  }
 0x141   :  { %3227 = vmatprep.subr.bf16.mxu0 %v4976_v61  ;;  %3119 = vmatpush1.bf16.msra.mxu1 %v5013_v62  ;;  %v5046_v61 = vld [vmem:[#allocation7 + $0x2d8] ss:$20 sps:$4 sm:$0xff]   ;;  %v5051_v62 = vld [vmem:[#allocation7 + $0x2fc] ss:$20 sps:$4 sm:$0xff]  }
 0x142   :  { %3120 = vmatprep.subr.bf16.mxu1 %v5021_v48  ;;  %v5054_v48 = vld [vmem:[#allocation7 + $0x304] ss:$20 sps:$4 sm:$0xff]  }
 0x144   :  { %3228 = vmatpush1.bf16.msra.mxu0 %v4974_v30  ;;  %v5049_v30 = vld [vmem:[#allocation7 + $0x2f8] ss:$20 sps:$4 sm:$0xff]  }
 0x145   :  { %3229 = vmatprep.subr.bf16.mxu0 %v4982_v63  ;;  %3121 = vmatpush1.bf16.msra.mxu1 %v5019_v0  ;;  %v5052_v63 = vld [vmem:[#allocation7 + $0x300] ss:$20 sps:$4 sm:$0xff]   ;;  %v5057_v0 = vld [vmem:[#allocation7 + $0x324] ss:$20 sps:$4 sm:$0xff]  }
 0x146   :  { %3122 = vmatprep.subr.bf16.mxu1 %v5027_v1  ;;  %v5060_v1 = vld [vmem:[#allocation7 + $0x32c] ss:$20 sps:$4 sm:$0xff]  }
 0x148   :  { %3230 = vmatpush1.bf16.msra.mxu0 %v4980_v2  ;;  %v5055_v2 = vld [vmem:[#allocation7 + $0x320] ss:$20 sps:$4 sm:$0xff]  }
 0x149   :  { %3231 = vmatprep.subr.bf16.mxu0 %v4988_v3  ;;  %3123 = vmatpush1.bf16.msra.mxu1 %v5025_v4  ;;  %v5058_v3 = vld [vmem:[#allocation7 + $0x328] ss:$20 sps:$4 sm:$0xff]   ;;  %v5063_v4 = vld [vmem:[#allocation7 + $0x34c] ss:$20 sps:$4 sm:$0xff]  }
 0x14a   :  { %3133 = vmatprep.subr.bf16.mxu1 %v5033_v6  ;;  %v5066_v6 = vld [vmem:[#allocation7 + $0x354] ss:$20 sps:$4 sm:$0xff]  }
 0x14c   :  { %3232 = vmatpush1.bf16.msra.mxu0 %v4986_v7  ;;  %v5061_v7 = vld [vmem:[#allocation7 + $0x348] ss:$20 sps:$4 sm:$0xff]  }
 0x14d   :  { %3233 = vmatprep.subr.bf16.mxu0 %v4994_v8  ;;  %v5064_v8 = vld [vmem:[#allocation7 + $0x350] ss:$20 sps:$4 sm:$0xff]  }
 0x150   :  { %3234 = vmatpush1.bf16.msra.mxu0 %v4992_v9  ;;  %v5069_v9 = vld [vmem:[#allocation7 + $0x374] ss:$20 sps:$4 sm:$0xff]  }
 0x151   :  { %3235 = vmatprep.subr.bf16.mxu0 %v5000_v11  ;;  %v5072_v11 = vld [vmem:[#allocation7 + $0x37c] ss:$20 sps:$4 sm:$0xff]  }
 0x154   :  { %3236 = vmatpush1.bf16.msra.mxu0 %v4998_v12  ;;  %v344_v12 = vsub.s32 4, %v5532_v25 }
 0x155   :  { %3237 = vmatprep.subr.bf16.mxu0 %v5006_v13  ;;  %v5067_v13 = vld [vmem:[#allocation7 + $0x370] ss:$20 sps:$4 sm:$0xff]  }
 0x158   :  { %3238 = vmatpush1.bf16.msra.mxu0 %v5004_v14  ;;  %v5070_v14 = vld [vmem:[#allocation7 + $0x378] ss:$20 sps:$4 sm:$0xff]  }
 0x159   :  { %3239 = vmatprep.subr.bf16.mxu0 %v5012_v15  ;;  %v5075_v15 = vld [vmem:[#allocation7 + $0x39c] ss:$20 sps:$4 sm:$0xff]  }
 0x15c   :  { %3240 = vmatpush1.bf16.msra.mxu0 %v5010_v17  ;;  %v5078_v17 = vld [vmem:[#allocation7 + $0x3a4] ss:$20 sps:$4 sm:$0xff]  }
 0x15d   :  { %3241 = vmatprep.subr.bf16.mxu0 %v5018_v18 }
 0x160   :  { %3242 = vmatpush1.bf16.msra.mxu0 %v5016_v20  ;;  %v345_v20 = vrot.slane %v5538_v27, %v344_v12 }
 0x161   :  { %3243 = vmatprep.subr.bf16.mxu0 %v5024_v21 }
 0x164   :  { %3244 = vmatpush1.bf16.msra.mxu0 %v5022_v22 }
 0x165   :  { %3245 = vmatprep.subr.bf16.mxu0 %v5030_v23 }
 0x168   :  { %3246 = vmatpush1.bf16.msra.mxu0 %v5028_v5  ;;  %v5073_v5 = vld [vmem:[#allocation7 + $0x398] ss:$20 sps:$4 sm:$0xff]  }
 0x169   :  { %3256 = vmatprep.subr.bf16.mxu0 %v5036_v10  ;;  %v5076_v10 = vld [vmem:[#allocation7 + $0x3a0] ss:$20 sps:$4 sm:$0xff]  }
 0x1be   :  { %v1525_v34 = vpop.f32.mrb[0].mxu0  ;;  %v5551_v35 = vpop.f32.mrb[0].mxu1 }
 0x1bf   :  { %v4598_v36 = vadd.f32 %v1525_v34, %v329_v31  ;;  %v1527_v37 = vpop.f32.mrb[1].mxu0  ;;  %v1650_v38 = vpop.f32.mrb[1].mxu1  ;;  %v5081_v34 = vld [vmem:[#allocation7 + $0x3c4] ss:$20 sps:$4 sm:$0xff]  }
 0x1c0   :  { %v4599_v39 = vadd.f32 %v1527_v37, %v333_v32  ;;  %v4601_v40 = vadd.f32 %v1650_v38, %v341_v33  ;;  %v1529_v41 = vpop.f32.mrb[2].mxu0  ;;  %v1652_v42 = vpop.f32.mrb[2].mxu1 }
 0x1c1   :  { %v1775_v43 = vmax.f32 %v4598_v36, 0.0  ;;  %v1530_v45 = vpop.f32.mrb[3].mxu0  ;;  %v1653_v46 = vpop.f32.mrb[3].mxu1  ;;  %v5084_v36 = vld [vmem:[#allocation7 + $0x3cc] ss:$20 sps:$4 sm:$0xff]  }
 0x1c2   :  { %v1776_v47 = vmax.f32 %v4599_v39, 0.0  ;;  %v1778_v49 = vmax.f32 %v4601_v40, 0.0  ;;  %v5079_v40 = vld [vmem:[#allocation7 + $0x3c0] ss:$20 sps:$4 sm:$0xff]   ;;  %v5082_v41 = vld [vmem:[#allocation7 + $0x3c8] ss:$20 sps:$4 sm:$0xff]  }
 0x1c3   :  { %v5555_v53 = vpack.c.bf16 %v1775_v43, %v1775_v43  ;;  %v5087_v43 = vld [vmem:[#allocation7 + $0x3ec] ss:$20 sps:$4 sm:$0xff]   ;;  %v5090_v45 = vld [vmem:[#allocation7 + $0x3f4] ss:$20 sps:$4 sm:$0xff]  }
 0x1c4   :  { %v5553_v50 = vpack.c.bf16 %v1776_v47, %v1776_v47  ;;  %v5559_v44 = vpack.c.bf16 %v1778_v49, %v1778_v49  ;;  %v5085_v46 = vld [vmem:[#allocation7 + $0x3e8] ss:$20 sps:$4 sm:$0xff]   ;;  %v5088_v47 = vld [vmem:[#allocation7 + $0x3f0] ss:$20 sps:$4 sm:$0xff]  }
 0x1c5   :  { %v5093_v49 = vld [vmem:[#allocation7 + $0x414] ss:$20 sps:$4 sm:$0xff]  }
 0x1c6   :  { %3124 = vmatprep.mubr.bf16.mxu1 %v5553_v50  ;;  %3247 = vmatprep.mubr.bf16.mxu0 %v5553_v50 }
 0x1c7   :  { %3125 = vmatmul.mubr.bf16.vlgmr.msra.gmra.mrb[8].mxu1 %v5555_v53  ;;  %3248 = vmatmul.mubr.bf16.vlgmr.msra.gmra.mrb[12].mxu0 %v5555_v53 }
 0x1c8   :  { %3134 = vmatpush1.bf16.msra.mxu1 %v5031_v51  ;;  %3257 = vmatpush1.bf16.msra.mxu0 %v5034_v52  ;;  %v5096_v51 = vld [vmem:[#allocation7 + $0x41c] ss:$20 sps:$4 sm:$0xff]  }
 0x1c9   :  { %3165 = vmatprep.mubr.bf16.mxu1 %v5559_v44  ;;  %3288 = vmatprep.mubr.bf16.mxu0 %v5559_v44  ;;  %v5091_v52 = vld [vmem:[#allocation7 + $0x410] ss:$20 sps:$4 sm:$0xff]  }
 0x1ca   :  { %3135 = vmatprep.subr.bf16.mxu1 %v5039_v54  ;;  %3258 = vmatprep.subr.bf16.mxu0 %v5042_v55  ;;  %v5094_v54 = vld [vmem:[#allocation7 + $0x418] ss:$20 sps:$4 sm:$0xff]   ;;  %v5099_v55 = vld [vmem:[#allocation7 + $0x43c] ss:$20 sps:$4 sm:$0xff]  }
 0x1cc   :  { %3136 = vmatpush1.bf16.msra.mxu1 %v5037_v56  ;;  %3259 = vmatpush1.bf16.msra.mxu0 %v5040_v57  ;;  %v5102_v56 = vld [vmem:[#allocation7 + $0x444] ss:$20 sps:$4 sm:$0xff]  }
 0x1cd   :  { %3137 = vmatprep.subr.bf16.mxu1 %v5045_v58  ;;  %3260 = vmatprep.subr.bf16.mxu0 %v5048_v59  ;;  %v5097_v57 = vld [vmem:[#allocation7 + $0x438] ss:$20 sps:$4 sm:$0xff]   ;;  %v5100_v58 = vld [vmem:[#allocation7 + $0x440] ss:$20 sps:$4 sm:$0xff]  }
 0x1ce   :  { %v5105_v59 = vld [vmem:[#allocation7 + $0x464] ss:$20 sps:$4 sm:$0xff]  }
 0x1d0   :  { %3138 = vmatpush1.bf16.msra.mxu1 %v5043_v60  ;;  %3261 = vmatpush1.bf16.msra.mxu0 %v5046_v61  ;;  %v5108_v60 = vld [vmem:[#allocation7 + $0x46c] ss:$20 sps:$4 sm:$0xff]  }
 0x1d1   :  { %3139 = vmatprep.subr.bf16.mxu1 %v5051_v62  ;;  %3262 = vmatprep.subr.bf16.mxu0 %v5054_v48  ;;  %v5103_v61 = vld [vmem:[#allocation7 + $0x460] ss:$20 sps:$4 sm:$0xff]   ;;  %v5106_v62 = vld [vmem:[#allocation7 + $0x468] ss:$20 sps:$4 sm:$0xff]   ;;  %v336_v48 = vsub.s32 2, %v5532_v25 }
 0x1d4   :  { %3140 = vmatpush1.bf16.msra.mxu1 %v5049_v30  ;;  %3263 = vmatpush1.bf16.msra.mxu0 %v5052_v63  ;;  %v5111_v30 = vld [vmem:[#allocation7 + $0x48c] ss:$20 sps:$4 sm:$0xff]   ;;  %v5114_v63 = vld [vmem:[#allocation7 + $0x494] ss:$20 sps:$4 sm:$0xff]  }
 0x1d5   :  { %3141 = vmatprep.subr.bf16.mxu1 %v5057_v0  ;;  %3264 = vmatprep.subr.bf16.mxu0 %v5060_v1  ;;  %v5109_v0 = vld [vmem:[#allocation7 + $0x488] ss:$20 sps:$4 sm:$0xff]   ;;  %v5112_v1 = vld [vmem:[#allocation7 + $0x490] ss:$20 sps:$4 sm:$0xff]  }
 0x1d8   :  { %3142 = vmatpush1.bf16.msra.mxu1 %v5055_v2  ;;  %3265 = vmatpush1.bf16.msra.mxu0 %v5058_v3  ;;  %v337_v2 = vrot.slane %v5538_v27, %v336_v48  ;;  %v5117_v3 = vld [vmem:[#allocation7 + $0x4b4] ss:$20 sps:$4 sm:$0xff]   ;;  %v5121_v27 = vld [vmem:[#allocation7 + $0x4d8] ss:$20 sps:$4 sm:$0xff]  }
 0x1d9   :  { %3143 = vmatprep.subr.bf16.mxu1 %v5063_v4  ;;  %3266 = vmatprep.subr.bf16.mxu0 %v5066_v6  ;;  %v5120_v4 = vld [vmem:[#allocation7 + $0x4bc] ss:$20 sps:$4 sm:$0xff]  }
 0x1da   :  { %v5115_v6 = vld [vmem:[#allocation7 + $0x4b0] ss:$20 sps:$4 sm:$0xff]  }
 0x1dc   :  { %3144 = vmatpush1.bf16.msra.mxu1 %v5061_v7  ;;  %3267 = vmatpush1.bf16.msra.mxu0 %v5064_v8  ;;  %v5118_v7 = vld [vmem:[#allocation7 + $0x4b8] ss:$20 sps:$4 sm:$0xff]   ;;  %v4600_v8 = vadd.f32 %v5551_v35, %v337_v2  ;;  %v5127_v35 = vld [vmem:[#allocation7 + $0x500] ss:$20 sps:$4 sm:$0xff]   ;;  %v5178_v2 = vld [vmem:[#allocation7 + $0x290] ss:$20 sps:$4 sm:$0xff]  }
 0x1dd   :  { %3145 = vmatprep.subr.bf16.mxu1 %v5069_v9  ;;  %3268 = vmatprep.subr.bf16.mxu0 %v5072_v11  ;;  %v5123_v9 = vld [vmem:[#allocation7 + $0x4dc] ss:$20 sps:$4 sm:$0xff]   ;;  %v5126_v11 = vld [vmem:[#allocation7 + $0x4e4] ss:$20 sps:$4 sm:$0xff]  }
 0x1de   :  { %v4395_v18 = vpop.f32.mrb[4].mxu0  ;;  %v4417_v21 = vpop.f32.mrb[4].mxu1 }
 0x1df   :  { %v4396_v22 = vpop.f32.mrb[5].mxu0  ;;  %v4418_v23 = vpop.f32.mrb[5].mxu1 }
 0x1e0   :  { %3146 = vmatpush1.bf16.msra.mxu1 %v5067_v13  ;;  %3269 = vmatpush1.bf16.msra.mxu0 %v5070_v14  ;;  %v4397_v24 = vadd.f32 %v4396_v22, %v4395_v18  ;;  %v4398_v31 = vpop.f32.mrb[6].mxu0  ;;  %v4419_v32 = vadd.f32 %v4418_v23, %v4417_v21  ;;  %v4420_v33 = vpop.f32.mrb[6].mxu1  ;;  %v5129_v21 = vld [vmem:[#allocation7 + $0x504] ss:$20 sps:$4 sm:$0xff]   ;;  %v5132_v22 = vld [vmem:[#allocation7 + $0x50c] ss:$20 sps:$4 sm:$0xff]  }
 0x1e1   :  { %3147 = vmatprep.subr.bf16.mxu1 %v5075_v15  ;;  %3270 = vmatprep.subr.bf16.mxu0 %v5078_v17  ;;  %v4399_v37 = vpop.f32.mrb[7].mxu0  ;;  %v4421_v38 = vpop.f32.mrb[7].mxu1  ;;  %v5124_v17 = vld [vmem:[#allocation7 + $0x4e0] ss:$20 sps:$4 sm:$0xff]   ;;  %v5136_v33 = vld [vmem:[#allocation7 + $0x530] ss:$20 sps:$4 sm:$0xff]  }
 0x1e2   :  { %v1690_v39 = vadd.f32 %v4397_v24, %v345_v20  ;;  %v1777_v20 = vmax.f32 %v4600_v8, 0.0  ;;  %v5135_v24 = vld [vmem:[#allocation7 + $0x52c] ss:$20 sps:$4 sm:$0xff]   ;;  %v5138_v31 = vld [vmem:[#allocation7 + $0x534] ss:$20 sps:$4 sm:$0xff]  }
 0x1e3   :  { %v5139_v37 = vld [vmem:[#allocation7 + $0x550] ss:$20 sps:$4 sm:$0xff]   ;;  %v5142_v38 = vld [vmem:[#allocation7 + $0x558] ss:$20 sps:$4 sm:$0xff]   ;;  %v5183_v8 = vld [vmem:[#allocation7 + $0x1a0] ss:$20 sps:$4 sm:$0xff]  }
 0x1e4   :  { %3148 = vmatpush1.bf16.msra.mxu1 %v5073_v5  ;;  %3271 = vmatpush1.bf16.msra.mxu0 %v5076_v10  ;;  %v1730_v42 = vadd.f32 %v4419_v32, %v1690_v39  ;;  %v5130_v5 = vld [vmem:[#allocation7 + $0x508] ss:$20 sps:$4 sm:$0xff]   ;;  %v5576_v10 = vpack.c.bf16 %v1777_v20, %v1777_v20  ;;  %v5194_v20 = vld [vmem:[#allocation7 + $0x330] ss:$20 sps:$4 sm:$0xff]  }
 0x1e5   :  { %3149 = vmatprep.subr.bf16.mxu1 %v5081_v34  ;;  %3272 = vmatprep.subr.bf16.mxu0 %v5084_v36  ;;  %v5133_v32 = vld [vmem:[#allocation7 + $0x528] ss:$20 sps:$4 sm:$0xff]  }
 0x1e6   :  { %v5141_v34 = vld [vmem:[#allocation7 + $0x554] ss:$20 sps:$4 sm:$0xff]   ;;  %v5144_v36 = vld [vmem:[#allocation7 + $0x55c] ss:$20 sps:$4 sm:$0xff]  }
 0x1e7   :  { %v5147_v39 = vld [vmem:[#allocation7 + $0x57c] ss:$20 sps:$4 sm:$0xff]  }
 0x1e8   :  { %3150 = vmatpush1.bf16.msra.mxu1 %v5079_v40  ;;  %3273 = vmatpush1.bf16.msra.mxu0 %v5082_v41  ;;  %v5150_v40 = vld [vmem:[#allocation7 + $0x584] ss:$20 sps:$4 sm:$0xff]  }
 0x1e9   :  { %3151 = vmatprep.subr.bf16.mxu1 %v5087_v43  ;;  %3274 = vmatprep.subr.bf16.mxu0 %v5090_v45  ;;  %v5145_v41 = vld [vmem:[#allocation7 + $0x578] ss:$20 sps:$4 sm:$0xff]  }
 0x1ea   :  { %v5153_v43 = vld [vmem:[#allocation7 + $0x5a4] ss:$20 sps:$4 sm:$0xff]   ;;  %v5156_v45 = vld [vmem:[#allocation7 + $0x5ac] ss:$20 sps:$4 sm:$0xff]  }
 0x1ec   :  { %3152 = vmatpush1.bf16.msra.mxu1 %v5085_v46  ;;  %3275 = vmatpush1.bf16.msra.mxu0 %v5088_v47  ;;  %v5151_v46 = vld [vmem:[#allocation7 + $0x5a0] ss:$20 sps:$4 sm:$0xff]  }
 0x1ed   :  { %3153 = vmatprep.subr.bf16.mxu1 %v5093_v49  ;;  %3276 = vmatprep.subr.bf16.mxu0 %v5096_v51  ;;  %v5159_v47 = vld [vmem:[#allocation7 + $0x5cc] ss:$20 sps:$4 sm:$0xff]   ;;  %v5162_v49 = vld [vmem:[#allocation7 + $0x5d4] ss:$20 sps:$4 sm:$0xff]  }
 0x1ee   :  { %v5157_v51 = vld [vmem:[#allocation7 + $0x5c8] ss:$20 sps:$4 sm:$0xff]  }
 0x1f0   :  { %3154 = vmatpush1.bf16.msra.mxu1 %v5091_v52  ;;  %3277 = vmatpush1.bf16.msra.mxu0 %v5094_v54  ;;  %v5160_v52 = vld [vmem:[#allocation7 + $0x5d0] ss:$20 sps:$4 sm:$0xff]   ;;  %v5165_v54 = vld [vmem:[#allocation7 + $0x5f4] ss:$20 sps:$4 sm:$0xff]  }
 0x1f1   :  { %3155 = vmatprep.subr.bf16.mxu1 %v5099_v55  ;;  %3278 = vmatprep.subr.bf16.mxu0 %v5102_v56  ;;  %v5168_v55 = vld [vmem:[#allocation7 + $0x5fc] ss:$20 sps:$4 sm:$0xff]  }
 0x1f2   :  { %v5163_v56 = vld [vmem:[#allocation7 + $0x5f0] ss:$20 sps:$4 sm:$0xff]  }
 0x1f4   :  { %3156 = vmatpush1.bf16.msra.mxu1 %v5097_v57  ;;  %3279 = vmatpush1.bf16.msra.mxu0 %v5100_v58  ;;  %v5166_v57 = vld [vmem:[#allocation7 + $0x5f8] ss:$20 sps:$4 sm:$0xff]   ;;  %v5171_v58 = vld [vmem:[#allocation7 + $0x61c] ss:$20 sps:$4 sm:$0xff]  }
 0x1f5   :  { %3157 = vmatprep.subr.bf16.mxu1 %v5105_v59  ;;  %3280 = vmatprep.subr.bf16.mxu0 %v5108_v60  ;;  %v5174_v59 = vld [vmem:[#allocation7 + $0x624] ss:$20 sps:$4 sm:$0xff]  }
 0x1f6   :  { %v5169_v60 = vld [vmem:[#allocation7 + $0x618] ss:$20 sps:$4 sm:$0xff]  }
 0x1f8   :  { %3158 = vmatpush1.bf16.msra.mxu1 %v5103_v61  ;;  %3281 = vmatpush1.bf16.msra.mxu0 %v5106_v62  ;;  %v5172_v61 = vld [vmem:[#allocation7 + $0x620] ss:$20 sps:$4 sm:$0xff]  }
 0x1f9   :  { %3159 = vmatprep.subr.bf16.mxu1 %v5111_v30  ;;  %3282 = vmatprep.subr.bf16.mxu0 %v5114_v63  ;;  %v5175_v30 = vld [vmem:[#allocation7 + $0x150] ss:$20 sps:$4 sm:$0xff]  }
 0x1fa   :  { %v5176_v63 = vld [vmem:[#allocation7 + $0x3d0] ss:$20 sps:$4 sm:$0xff]  }
 0x1fc   :  { %3160 = vmatpush1.bf16.msra.mxu1 %v5109_v0  ;;  %3283 = vmatpush1.bf16.msra.mxu0 %v5112_v1  ;;  %v5177_v0 = vld [vmem:[#allocation7 + $0x10] ss:$20 sps:$4 sm:$0xff]  }
 0x1fd   :  { %3161 = vmatprep.subr.bf16.mxu1 %v5117_v3  ;;  %3284 = vmatprep.subr.bf16.mxu0 %v5120_v4  ;;  %v5179_v3 = vld [vmem:[#allocation7 + $0x178] ss:$20 sps:$4 sm:$0xff]  }
 0x1fe   :  { %v1769_v13 = vpop.f32.mrb[8].mxu0  ;;  %v5180_v4 = vld [vmem:[#allocation7 + $0x3f8] ss:$20 sps:$4 sm:$0xff]  }
 0x1ff   :  { %v5574_v14 = vadd.f32 %v1769_v13, %v1730_v42  ;;  %v4556_v15 = vpop.f32.mrb[9].mxu0  ;;  %v5148_v42 = vld [vmem:[#allocation7 + $0x580] ss:$20 sps:$4 sm:$0xff]  }
 0x200   :  { %3162 = vmatpush1.bf16.msra.mxu1 %v5115_v6  ;;  %3285 = vmatpush1.bf16.msra.mxu0 %v5118_v7  ;;  %v1772_v18 = vpop.f32.mrb[10].mxu0  ;;  %v5181_v6 = vld [vmem:[#allocation7 + $0x38] ss:$20 sps:$4 sm:$0xff]   ;;  %v5186_v13 = vld [vmem:[#allocation7 + $0x2e0] ss:$20 sps:$4 sm:$0xff]  }
 0x201   :  { %3163 = vmatprep.subr.bf16.mxu1 %v5123_v9  ;;  %3286 = vmatprep.subr.bf16.mxu0 %v5126_v11  ;;  %v4557_v23 = vpop.f32.mrb[11].mxu0  ;;  %v1779_v62 = vmax.f32 %v5574_v14, 0.0  ;;  %v5182_v7 = vld [vmem:[#allocation7 + $0x2b8] ss:$20 sps:$4 sm:$0xff]   ;;  %v5184_v9 = vld [vmem:[#allocation7 + $0x420] ss:$20 sps:$4 sm:$0xff]  }
 0x202   :  { %v5185_v11 = vld [vmem:[#allocation7 + $0x60] ss:$20 sps:$4 sm:$0xff]   ;;  %v5187_v14 = vld [vmem:[#allocation7 + $0x1c8] ss:$20 sps:$4 sm:$0xff]   ;;  %v5193_v18 = vld [vmem:[#allocation7 + $0xb0] ss:$20 sps:$4 sm:$0xff]  }
 0x203   :  { %v5583_v1 = vpack.c.bf16 %v1779_v62, %v1779_v62  ;;  %v5188_v15 = vld [vmem:[#allocation7 + $0x448] ss:$20 sps:$4 sm:$0xff]   ;;  %v5197_v23 = vld [vmem:[#allocation7 + $0xd8] ss:$20 sps:$4 sm:$0xff]  }
 0x204   :  { %3164 = vmatpush1.bf16.msra.mxu1 %v5121_v27  ;;  %3287 = vmatpush1.bf16.msra.mxu0 %v5124_v17  ;;  %v5189_v27 = vld [vmem:[#allocation7 + $0x88] ss:$20 sps:$4 sm:$0xff]   ;;  %v5191_v17 = vld [vmem:[#allocation7 + $0x1f0] ss:$20 sps:$4 sm:$0xff]  }
 0x205   :  { %3174 = vmatprep.subr.bf16.mxu1 %v5129_v21  ;;  %3297 = vmatprep.subr.bf16.mxu0 %v5132_v22  ;;  %v5195_v21 = vld [vmem:[#allocation7 + $0x218] ss:$20 sps:$4 sm:$0xff]  }
 0x206   :  { %v5196_v22 = vld [vmem:[#allocation7 + $0x498] ss:$20 sps:$4 sm:$0xff]  }
 0x207   :  { %3166 = vmatmul.mubr.bf16.vlgmr.msra.gmra.mrb[8].mxu1 %v5576_v10  ;;  %3289 = vmatmul.mubr.bf16.vlgmr.msra.gmra.mrb[12].mxu0 %v5576_v10  ;;  %v5230_v62 = vld [vmem:[#allocation8 + $0x98] sm:$0xff]  }
 0x208   :  { %3175 = vmatpush1.bf16.msra.mxu1 %v5127_v35  ;;  %3298 = vmatpush1.bf16.msra.mxu0 %v5130_v5  ;;  %v5198_v35 = vld [vmem:[#allocation7 + $0x358] ss:$20 sps:$4 sm:$0xff]   ;;  %v5199_v5 = vld [vmem:[#allocation7 + $0x240] ss:$20 sps:$4 sm:$0xff]  }
 0x209   :  { %3176 = vmatprep.subr.bf16.mxu1 %v5135_v24  ;;  %3299 = vmatprep.subr.bf16.mxu0 %v5138_v31  ;;  %v5200_v24 = vld [vmem:[#allocation7 + $0x4c0] ss:$20 sps:$4 sm:$0xff]  }
 0x20a   :  { %3206 = vmatprep.mubr.bf16.mxu1 %v5391_v19  ;;  %3329 = vmatprep.mubr.bf16.mxu0 %v5391_v19  ;;  %v5154_v19 = vld [vmem:[#allocation7 + $0x5a8] ss:$20 sps:$4 sm:$0xff]   ;;  %v5201_v31 = vld [vmem:[#allocation7 + $0x100] ss:$20 sps:$4 sm:$0xff]  }
 0x20c   :  { %3177 = vmatpush1.bf16.msra.mxu1 %v5133_v32  ;;  %3300 = vmatpush1.bf16.msra.mxu0 %v5136_v33  ;;  %v5202_v32 = vld [vmem:[#allocation7 + $0x380] ss:$20 sps:$4 sm:$0xff]   ;;  %v5203_v33 = vld [vmem:[#allocation7 + $0x268] ss:$20 sps:$4 sm:$0xff]  }
 0x20d   :  { %3178 = vmatprep.subr.bf16.mxu1 %v5141_v34  ;;  %3301 = vmatprep.subr.bf16.mxu0 %v5144_v36  ;;  %v5204_v34 = vld [vmem:[#allocation7 + $0x4e8] ss:$20 sps:$4 sm:$0xff]  }
 0x20e   :  { %v5205_v36 = vld [vmem:[#allocation7 + $0x128] ss:$20 sps:$4 sm:$0xff]  }
 0x210   :  { %3179 = vmatpush1.bf16.msra.mxu1 %v5139_v37  ;;  %3302 = vmatpush1.bf16.msra.mxu0 %v5142_v38  ;;  %v5206_v37 = vld [vmem:[#allocation7 + $0x3a8] ss:$20 sps:$4 sm:$0xff]   ;;  %v5215_v38 = vld [vmem:[#allocation8 + $0x40] sm:$0xff]  }
 0x211   :  { %3180 = vmatprep.subr.bf16.mxu1 %v5147_v39  ;;  %3303 = vmatprep.subr.bf16.mxu0 %v5150_v40  ;;  %v5207_v39 = vld [vmem:[#allocation7 + $0x510] ss:$20 sps:$4 sm:$0xff]  }
 0x212   :  { %v5217_v40 = vld [vmem:[#allocation8] sm:$0xff]  }
 0x214   :  { %3181 = vmatpush1.bf16.msra.mxu1 %v5145_v41  ;;  %3304 = vmatpush1.bf16.msra.mxu0 %v5148_v42  ;;  %v5219_v41 = vld [vmem:[#allocation8 + $0x48] sm:$0xff]  }
 0x215   :  { %3182 = vmatprep.subr.bf16.mxu1 %v5153_v43  ;;  %3305 = vmatprep.subr.bf16.mxu0 %v5156_v45  ;;  %v5208_v42 = vld [vmem:[#allocation7 + $0x538] ss:$20 sps:$4 sm:$0xff]   ;;  %v5223_v45 = vld [vmem:[#allocation8 + $0x50] sm:$0xff]  }
 0x216   :  { %v5221_v43 = vld [vmem:[#allocation8 + $0x8] sm:$0xff]  }
 0x218   :  { %3183 = vmatpush1.bf16.msra.mxu1 %v5151_v46  ;;  %3306 = vmatpush1.bf16.msra.mxu0 %v5154_v19  ;;  %v5209_v46 = vld [vmem:[#allocation7 + $0x560] ss:$20 sps:$4 sm:$0xff]   ;;  %v5227_v19 = vld [vmem:[#allocation8 + $0x58] sm:$0xff]  }
 0x219   :  { %3184 = vmatprep.subr.bf16.mxu1 %v5159_v47  ;;  %3307 = vmatprep.subr.bf16.mxu0 %v5162_v49  ;;  %v5229_v47 = vld [vmem:[#allocation8 + $0x18] sm:$0xff]   ;;  %v5211_v49 = vld [vmem:[#allocation7 + $0x5b0] ss:$20 sps:$4 sm:$0xff]  }
 0x21c   :  { %3185 = vmatpush1.bf16.msra.mxu1 %v5157_v51  ;;  %3308 = vmatpush1.bf16.msra.mxu0 %v5160_v52  ;;  %v5212_v51 = vld [vmem:[#allocation7 + $0x5d8] ss:$20 sps:$4 sm:$0xff]   ;;  %v5213_v52 = vld [vmem:[#allocation7 + $0x600] ss:$20 sps:$4 sm:$0xff]  }
 0x21d   :  { %3186 = vmatprep.subr.bf16.mxu1 %v5165_v54  ;;  %3309 = vmatprep.subr.bf16.mxu0 %v5168_v55  ;;  %v5214_v54 = vld [vmem:[#allocation7 + $0x628] ss:$20 sps:$4 sm:$0xff]   ;;  %v5216_v55 = vld [vmem:[#allocation8 + $0xc0] sm:$0xff]  }
 0x220   :  { %3187 = vmatpush1.bf16.msra.mxu1 %v5163_v56  ;;  %3310 = vmatpush1.bf16.msra.mxu0 %v5166_v57  ;;  %v5218_v56 = vld [vmem:[#allocation8 + $0x80] sm:$0xff]   ;;  %v5220_v57 = vld [vmem:[#allocation8 + $0xc8] sm:$0xff]  }
 0x221   :  { %3188 = vmatprep.subr.bf16.mxu1 %v5171_v58  ;;  %3311 = vmatprep.subr.bf16.mxu0 %v5174_v59  ;;  %v5222_v58 = vld [vmem:[#allocation8 + $0x88] sm:$0xff]   ;;  %v5224_v59 = vld [vmem:[#allocation8 + $0xd0] sm:$0xff]  }
 0x224   :  { %3189 = vmatpush1.bf16.msra.mxu1 %v5169_v60  ;;  %3312 = vmatpush1.bf16.msra.mxu0 %v5172_v61  ;;  %v5226_v60 = vld [vmem:[#allocation8 + $0x90] sm:$0xff]   ;;  %v5228_v61 = vld [vmem:[#allocation8 + $0xd8] sm:$0xff]  }
 0x225   :  { %4432 = vmatprep.subr.bf16.mxu1 %v5175_v30  ;;  %4454 = vmatprep.subr.bf16.mxu0 %v5176_v63  ;;  %v5231_v30 = vld [vmem:[#allocation8 + $0x60] sm:$0xff]  }
 0x226   :  { %v5232_v63 = vld [vmem:[#allocation8 + $0xe0] sm:$0xff]  }
 0x227   :  { %3207 = vmatmul.mubr.bf16.vlgmr.msra.gmra.mrb[8].mxu1 %v5583_v1  ;;  %3330 = vmatmul.mubr.bf16.vlgmr.msra.gmra.mrb[12].mxu0 %v5583_v1 }
 0x228   :  { %4433 = vmatpush3.bf16.msra.mxu1 %v5177_v0  ;;  %3370 = vmatprep.mubr.bf16.mxu1 %v5553_v50  ;;  %v5190_v50 = vld [vmem:[#allocation7 + $0x308] ss:$20 sps:$4 sm:$0xff]   ;;  %v5233_v0 = vld [vmem:[#allocation8 + $0x20] sm:$0xff]  }
 0x229   :  { %4455 = vmatpush3.bf16.msra.mxu0 %v5178_v2  ;;  %3410 = vmatprep.mubr.bf16.mxu0 %v5559_v44  ;;  %v5192_v44 = vld [vmem:[#allocation7 + $0x470] ss:$20 sps:$4 sm:$0xff]  }
 0x22a   :  { %4434 = vmatprep.subr.bf16.mxu1 %v5179_v3  ;;  %4456 = vmatprep.subr.bf16.mxu0 %v5180_v4  ;;  %v5234_v2 = vld [vmem:[#allocation8 + $0xa0] sm:$0xff]   ;;  %v5236_v3 = vld [vmem:[#allocation8 + $0xe8] sm:$0xff]  }
 0x22b   :  { %v5237_v4 = vld [vmem:[#allocation8 + $0x28] sm:$0xff]  }
 0x22c   :  { %4435 = vmatpush3.bf16.msra.mxu1 %v5181_v6  ;;  %v5238_v6 = vld [vmem:[#allocation8 + $0xa8] sm:$0xff]  }
 0x22d   :  { %4457 = vmatpush3.bf16.msra.mxu0 %v5182_v7  ;;  %4436 = vmatprep.subr.bf16.mxu1 %v5183_v8  ;;  %v5239_v7 = vld [vmem:[#allocation8 + $0x70] sm:$0xff]  }
 0x22e   :  { %4458 = vmatprep.subr.bf16.mxu0 %v5184_v9  ;;  %v5240_v8 = vld [vmem:[#allocation8 + $0xf0] sm:$0xff]  }
 0x22f   :  { %v5241_v9 = vld [vmem:[#allocation8 + $0x30] sm:$0xff]  }
 0x230   :  { %4437 = vmatpush3.bf16.msra.mxu1 %v5185_v11  ;;  %v5242_v11 = vld [vmem:[#allocation8 + $0xb0] sm:$0xff]  }
 0x231   :  { %4459 = vmatpush3.bf16.msra.mxu0 %v5186_v13  ;;  %4438 = vmatprep.subr.bf16.mxu1 %v5187_v14  ;;  %v5243_v13 = vld [vmem:[#allocation8 + $0x78] sm:$0xff]  }
 0x232   :  { %4460 = vmatprep.subr.bf16.mxu0 %v5188_v15  ;;  %v5244_v14 = vld [vmem:[#allocation8 + $0xf8] sm:$0xff]  }
 0x233   :  { %v5245_v15 = vld [vmem:[#allocation8 + $0x38] sm:$0xff]  }
 0x234   :  { %4439 = vmatpush3.bf16.msra.mxu1 %v5189_v27  ;;  %v5246_v27 = vld [vmem:[#allocation8 + $0xb8] sm:$0xff]  }
 0x235   :  { %4461 = vmatpush3.bf16.msra.mxu0 %v5190_v50  ;;  %4440 = vmatprep.subr.bf16.mxu1 %v5191_v17  ;;  %v2025_v50 = vld [vmem:[%s5644_s4] sm:$0x1f] }
 0x236   :  { %4462 = vmatprep.subr.bf16.mxu0 %v5192_v44  ;;  %v2030_v17 = vrot.slane %v2025_v50, %v328_v26  ;;  %v2038_v44 = vrot.slane %v2025_v50, %v336_v48 }
 0x238   :  { %4441 = vmatpush3.bf16.msra.mxu1 %v5193_v18  ;;  %v2034_v18 = vrot.slane %v2025_v50, %v332_v28 }
 0x239   :  { %4463 = vmatpush3.bf16.msra.mxu0 %v5194_v20  ;;  %4442 = vmatprep.subr.bf16.mxu1 %v5195_v21  ;;  %v2042_v20 = vrot.slane %v2025_v50, %v340_v29 }
 0x23a   :  { %4464 = vmatprep.subr.bf16.mxu0 %v5196_v22 }
 0x23c   :  { %4443 = vmatpush3.bf16.msra.mxu1 %v5197_v23 }
 0x23d   :  { %4465 = vmatpush3.bf16.msra.mxu0 %v5198_v35  ;;  %4444 = vmatprep.subr.bf16.mxu1 %v5199_v5 }
 0x23e   :  { %4466 = vmatprep.subr.bf16.mxu0 %v5200_v24 }
 0x240   :  { %4445 = vmatpush3.bf16.msra.mxu1 %v5201_v31 }
 0x241   :  { %4467 = vmatpush3.bf16.msra.mxu0 %v5202_v32  ;;  %4446 = vmatprep.subr.bf16.mxu1 %v5203_v33 }
 0x242   :  { %4468 = vmatprep.subr.bf16.mxu0 %v5204_v34 }
 0x244   :  { %4447 = vmatpush3.bf16.msra.mxu1 %v5205_v36 }
 0x245   :  { %4469 = vmatpush3.bf16.msra.mxu0 %v5206_v37  ;;  %4558 = vmatprep.subr.bf16.mxu1 %v5392_v16 }
 0x246   :  { %4485 = vmatprep.subr.bf16.mxu0 %v5215_v38 }
 0x247   :  { %3371 = vmatmul.mubr.bf16.vlgmr.msra.gmra.mrb[12].mxu1 %v5555_v53  ;;  %v5225_v53 = vld [vmem:[#allocation8 + $0x10] sm:$0xff]  }
 0x248   :  { %3411 = vmatmul.mubr.bf16.vlgmr.msra.gmra.mrb[16].mxu0 %v5576_v10  ;;  %4559 = vmatpush3.bf16.msra.mxu1 %v5207_v39  ;;  %v5210_v10 = vld [vmem:[#allocation7 + $0x588] ss:$20 sps:$4 sm:$0xff]   ;;  %v5247_v39 = vld [vmem:[#allocation8 + $0x100] sm:$0xff]  }
 0x249   :  { %4560 = vmatprep.subr.bf16.mxu1 %v5392_v16  ;;  %4574 = vmatprep.mubr.msk.bf16.mxu1 %vm5393_vm0, %v5392_v16 }
 0x24a   :  { %4486 = vmatpush3.bf16.msra.mxu0 %v5217_v40 }
 0x24b   :  { %4487 = vmatprep.subr.bf16.mxu0 %v5219_v41 }
 0x24c   :  { %4561 = vmatpush3.bf16.msra.mxu1 %v5208_v42 }
 0x24d   :  { %4562 = vmatprep.subr.bf16.mxu1 %v5392_v16 }
 0x24e   :  { %4488 = vmatpush3.bf16.msra.mxu0 %v5221_v43  ;;  %v5248_v43 = vld [vmem:[#allocation8 + $0x108] sm:$0xff]  }
 0x24f   :  { %4489 = vmatprep.subr.bf16.mxu0 %v5223_v45  ;;  %v5249_v45 = vld [vmem:[#allocation8 + $0x110] sm:$0xff]  }
 0x250   :  { %4563 = vmatpush3.bf16.msra.mxu1 %v5209_v46  ;;  %v5250_v46 = vld [vmem:[#allocation8 + $0x118] sm:$0xff]  }
 0x251   :  { %4564 = vmatprep.subr.bf16.mxu1 %v5392_v16 }
 0x252   :  { %4490 = vmatpush3.bf16.msra.mxu0 %v5225_v53 }
 0x253   :  { %4491 = vmatprep.subr.bf16.mxu0 %v5227_v19  ;;  %v2046_v19 = vrot.slane %v2025_v50, %v344_v12  ;;  %v5253_v12 = vld [vmem:[#allocation8 + $0x130] sm:$0xff]  }
 0x254   :  { %4565 = vmatpush3.bf16.msra.mxu1 %v5210_v10  ;;  %v5251_v10 = vld [vmem:[#allocation8 + $0x120] sm:$0xff]  }
 0x255   :  { %4566 = vmatprep.subr.bf16.mxu1 %v5392_v16 }
 0x256   :  { %4492 = vmatpush3.bf16.msra.mxu0 %v5229_v47 }
 0x257   :  { %4493 = vmatprep.subr.bf16.mxu0 %v5231_v30 }
 0x258   :  { %4567 = vmatpush3.bf16.msra.mxu1 %v5211_v49 }
 0x259   :  { %4568 = vmatprep.subr.bf16.mxu1 %v5392_v16 }
 0x25a   :  { %4494 = vmatpush3.bf16.msra.mxu0 %v5233_v0 }
 0x25c   :  { %4569 = vmatpush3.bf16.msra.mxu1 %v5212_v51 }
 0x25d   :  { %4570 = vmatprep.subr.bf16.mxu1 %v5392_v16 }
 0x260   :  { %4571 = vmatpush3.bf16.msra.mxu1 %v5213_v52 }
 0x261   :  { %4572 = vmatprep.subr.bf16.mxu1 %v5392_v16 }
 0x264   :  { %4573 = vmatpush3.bf16.msra.mxu1 %v5214_v54 }
 0x265   :  { %4507 = vmatprep.subr.bf16.mxu1 %v5216_v55 }
 0x267   :  { %4575 = vmatmul.mubr.bf16.vlgmr.msra.gmra.mrb[16].mxu1 %v5583_v1  ;;  %v5235_v1 = vld [vmem:[#allocation8 + $0x68] sm:$0xff]  }
 0x268   :  { %4508 = vmatpush3.bf16.msra.mxu1 %v5218_v56  ;;  %4495 = vmatprep.subr.bf16.mxu0 %v5235_v1 }
 0x269   :  { %4509 = vmatprep.subr.bf16.mxu1 %v5220_v57  ;;  %4496 = vmatpush3.bf16.msra.mxu0 %v5237_v4 }
 0x26a   :  { %4497 = vmatprep.subr.bf16.mxu0 %v5239_v7  ;;  %v4338_v7 = vld [vmem:[%s5646_s6] ss:$0 sm:$0xff]  ;;  %s5353_s6 = scalar_lea.vmem %s3923_s30, 128 }
 0x26b   :  { %p5354_p4 = scmp.ne.s32.totalorder %s3923_s30, %s5353_s6  ;;  %p5359_p6 = scmp.lt.s32.totalorder %s5353_s6, %s5353_s6 }
 0x26c   :  { %4510 = vmatpush3.bf16.msra.mxu1 %v5222_v58 }
 0x26d   :  { %4511 = vmatprep.subr.bf16.mxu1 %v5224_v59  ;;  %4498 = vmatpush3.bf16.msra.mxu0 %v5241_v9  ;;  %p5360_p7 = por %p5359_p6, %p5358_p5 }
 0x26e   :  { %4499 = vmatprep.subr.bf16.mxu0 %v5243_v13 }
 0x26f   :  { %p5361_p8 = pnand %p5360_p7, %p5354_p4 }
 0x270   :  { %4512 = vmatpush3.bf16.msra.mxu1 %v5226_v60  ;;  %v5252_v60 = vld [vmem:[#allocation8 + $0x128] sm:$0xff]  }
 0x271   :  { %4513 = vmatprep.subr.bf16.mxu1 %v5228_v61  ;;  %4500 = vmatpush3.bf16.msra.mxu0 %v5245_v15  ;;  %v5254_v61 = vld [vmem:[#allocation8 + $0x138] sm:$0xff]  }
 0x272   :  { %4578 = vmatprep.subr.bf16.mxu0 %v5392_v16 }
 0x274   :  { %4514 = vmatpush3.bf16.msra.mxu1 %v5230_v62 }
 0x275   :  { %4515 = vmatprep.subr.bf16.mxu1 %v5232_v63 }
 0x278   :  { %4516 = vmatpush3.bf16.msra.mxu1 %v5234_v2 }
 0x279   :  { %4517 = vmatprep.subr.bf16.mxu1 %v5236_v3 }
 0x27c   :  { %4518 = vmatpush3.bf16.msra.mxu1 %v5238_v6 }
 0x27d   :  { %4519 = vmatprep.subr.bf16.mxu1 %v5240_v8 }
 0x280   :  { %4520 = vmatpush3.bf16.msra.mxu1 %v5242_v11 }
 0x281   :  { %4521 = vmatprep.subr.bf16.mxu1 %v5244_v14 }
 0x284   :  { %4522 = vmatpush3.bf16.msra.mxu1 %v5246_v27 }
 0x2fa   :  { %v3208_v21 = vpop.f32.mrb[8].mxu1  ;;  %v3331_v22 = vpop.f32.mrb[12].mxu0 }
 0x2fb   :  { %v4602_v23 = vadd.f32 %v3208_v21, %v2030_v17  ;;  %v4604_v35 = vadd.f32 %v3331_v22, %v2038_v44  ;;  %v3210_v5 = vpop.f32.mrb[9].mxu1  ;;  %v3333_v24 = vpop.f32.mrb[13].mxu0 }
 0x2fc   :  { %v4603_v31 = vadd.f32 %v3210_v5, %v2034_v18  ;;  %v4605_v32 = vadd.f32 %v3333_v24, %v2042_v20  ;;  %v3212_v33 = vpop.f32.mrb[10].mxu1  ;;  %v3335_v34 = vpop.f32.mrb[14].mxu0 }
 0x2fd   :  { %5255 = vtanh.f32 %v4602_v23  ;;  %v3213_v26 = vpop.f32.mrb[11].mxu1  ;;  %v3336_v36 = vpop.f32.mrb[15].mxu0 }
 0x2fe   :  { %5257 = vtanh.f32 %v4604_v35 }
 0x2ff   :  { %5259 = vtanh.f32 %v4603_v31 }
 0x300   :  { %5261 = vtanh.f32 %v4605_v32 }
 0x307   :  { %v5256_v28 = vpop.eup %5255 }
 0x308   :  { %v5258_v48 = vpop.eup %5257  ;;  %v3463_v40 = vpack.c.bf16 %v5256_v28, %v5256_v28 }
 0x309   :  { %v5260_v37 = vpop.eup %5259  ;;  %v3465_v42 = vpack.c.bf16 %v5258_v48, %v5258_v48 }
 0x30a   :  { %v5262_v29 = vpop.eup %5261  ;;  %v3464_v38 = vpack.c.bf16 %v5260_v37, %v5260_v37 }
 0x30b   :  { %v3466_v41 = vpack.c.bf16 %v5262_v29, %v5262_v29 }
 0x30c   :  { %3827 = vmatprep.mubr.bf16.mxu0 %v3464_v38 }
 0x30d   :  { %3867 = vmatprep.mubr.bf16.mxu1 %v3466_v41  ;;  %3828 = vmatmul.mubr.bf16.vlgmr.msra.gmra.mrb[20].mxu0 %v3463_v40 }
 0x30e   :  { %3868 = vmatmul.mubr.bf16.vlgmr.msra.gmra.mrb[20].mxu1 %v3465_v42  ;;  %4579 = vmatpush3.bf16.msra.mxu0 %v5247_v39 }
 0x30f   :  { %4580 = vmatprep.subr.bf16.mxu0 %v5392_v16  ;;  %4594 = vmatprep.mubr.msk.bf16.mxu0 %vm5393_vm0, %v5392_v16 }
 0x312   :  { %4581 = vmatpush3.bf16.msra.mxu0 %v5248_v43 }
 0x313   :  { %4582 = vmatprep.subr.bf16.mxu0 %v5392_v16 }
 0x316   :  { %4583 = vmatpush3.bf16.msra.mxu0 %v5249_v45 }
 0x317   :  { %4584 = vmatprep.subr.bf16.mxu0 %v5392_v16 }
 0x31a   :  { %v4448_v53 = vpop.f32.mrb[12].mxu1  ;;  %4585 = vmatpush3.bf16.msra.mxu0 %v5250_v46 }
 0x31b   :  { %v4470_v47 = vpop.f32.mrb[16].mxu0  ;;  %v4449_v49 = vpop.f32.mrb[13].mxu1  ;;  %4586 = vmatprep.subr.bf16.mxu0 %v5392_v16 }
 0x31c   :  { %v4450_v51 = vadd.f32 %v4449_v49, %v4448_v53  ;;  %v4471_v52 = vpop.f32.mrb[17].mxu0  ;;  %v4451_v54 = vpop.f32.mrb[14].mxu1 }
 0x31d   :  { %v4472_v55 = vadd.f32 %v4471_v52, %v4470_v47  ;;  %v4473_v56 = vpop.f32.mrb[18].mxu0  ;;  %v4452_v57 = vpop.f32.mrb[15].mxu1 }
 0x31e   :  { %v3373_v58 = vadd.f32 %v4450_v51, %v2046_v19  ;;  %v4474_v59 = vpop.f32.mrb[19].mxu0  ;;  %4587 = vmatpush3.bf16.msra.mxu0 %v5251_v10 }
 0x31f   :  { %4588 = vmatprep.subr.bf16.mxu0 %v5392_v16 }
 0x320   :  { %v3413_v25 = vadd.f32 %v4472_v55, %v3373_v58 }
 0x322   :  { %4589 = vmatpush3.bf16.msra.mxu0 %v5252_v60 }
 0x323   :  { %4590 = vmatprep.subr.bf16.mxu0 %v5392_v16 }
 0x326   :  { %4591 = vmatpush3.bf16.msra.mxu0 %v5253_v12 }
 0x327   :  { %4592 = vmatprep.subr.bf16.mxu0 %v5392_v16 }
 0x32a   :  { %4593 = vmatpush3.bf16.msra.mxu0 %v5254_v61 }
 0x33a   :  { %v3452_v62 = vpop.f32.mrb[16].mxu1 }
 0x33b   :  { %v3453_v30 = vadd.f32 %v3452_v62, %v3413_v25  ;;  %v4576_v63 = vpop.f32.mrb[17].mxu1 }
 0x33c   :  { %v3455_v0 = vpop.f32.mrb[18].mxu1 }
 0x33d   :  { %5263 = vtanh.f32 %v3453_v30  ;;  %v4577_v2 = vpop.f32.mrb[19].mxu1 }
 0x347   :  { %v5264_v1 = vpop.eup %5263 }
 0x348   :  { %v3467_v3 = vpack.c.bf16 %v5264_v1, %v5264_v1 }
 0x34a   :  { %4595 = vmatmul.mubr.bf16.vlgmr.msra.gmra.mrb[24].mxu0 %v3467_v3 }
 0x3e0   :  { %v4501_v4 = vpop.f32.mrb[20].mxu0 }
 0x3e1   :  { %v4523_v6 = vpop.f32.mrb[20].mxu1  ;;  %v4502_v8 = vpop.f32.mrb[21].mxu0 }
 0x3e2   :  { %v4503_v9 = vadd.f32 %v4502_v8, %v4501_v4  ;;  %v4524_v11 = vpop.f32.mrb[21].mxu1  ;;  %v4504_v16 = vpop.f32.mrb[22].mxu0 }
 0x3e3   :  { %v4525_v13 = vadd.f32 %v4524_v11, %v4523_v6  ;;  %v4526_v14 = vpop.f32.mrb[22].mxu1  ;;  %v4505_v15 = vpop.f32.mrb[23].mxu0 }
 0x3e4   :  { %v3830_v27 = vadd.f32 %v4503_v9, %v4338_v7  ;;  %v4527_v50 = vpop.f32.mrb[23].mxu1 }
 0x3e6   :  { %v3870_v17 = vadd.f32 %v4525_v13, %v3830_v27 }
 0x41d   :  { %v3909_v44 = vpop.f32.mrb[24].mxu0 }
 0x41e   :  { %v3910_v18 = vadd.f32 %v3909_v44, %v3870_v17  ;;  %v4596_v20 = vpop.f32.mrb[25].mxu0 }
 0x41f   :  { %v3912_v21 = vpop.f32.mrb[26].mxu0 }
 0x420   :  { %3915 = vst [vmem:[#allocation10] sm:$0xff] %v3910_v18  ;;  %v4597_v22 = vpop.f32.mrb[27].mxu0 }
 0x421   :  { %5364 = shalt.err (!%p5361_p8)
}
 0x422   :  { %s5365_s10 = scalar_lea.hbm %s5647_s7, 128 }
 0x423   :  { %p5366_p9 = scmp.ne.s32.totalorder %s5647_s7, %s5365_s10  ;;  %p5369_p10 = scmp.lt.u32.totalorder %s5365_s10, %s5647_s7 }
 0x425   :  { %p5371_p11 = pnand %p5369_p10, %p5366_p9 }
 0x427   :  { %5374 = shalt.err (!%p5371_p11)
}
 0x428   :  { %3925 = dma.vmem_to_hbm [thread:$0]  %s3923_s30, 128, %s5647_s7, [#allocation4]  }
 0x429   :  { %5381 = dma.done.wait [#allocation4], 128  }
 0x42a   :  { %5382 = vsyncadd [#allocation4], 4294967168 }
 0x42b   :  { %3929 = vsyncpa [#allocation3], 1 }
 0x42c   :  { %3930 = vsyncpa [#allocation6], 1 }
 0x42d   :  { %3931 = vsyncpa [#allocation9], 1 }
 0x42e   :  { %3932 = vsyncpa [#allocation4], 1 }

</bundles_post_ra>
